<compile_context>
chip_gen: v7x
topology: tpu7x:2x2x1
jax: 0.10.0
libtpu: 0.0.40
codegen_flags: <defaults>
</compile_context>

<pallas_src>
import math

import jax
import jax.numpy as jnp
from jax import lax
from jax.experimental import pallas as pl
from jax.experimental.pallas import tpu as pltpu

NEG = -1000000000.0


def _round_up(x, m):
    return ((x + m - 1) // m) * m


def _vmem_budget_bytes():
    cap = 0
    try:
        cap = int(pltpu.get_tpu_info().vmem_capacity_bytes)
    except Exception:
        cap = 0
    if cap <= 0:
        cap = 64 << 20            # conservative fallback: v7x per-core VMEM
    return int(0.75 * cap)        # headroom for Mosaic internal scratch/spills


def _default_elementwise_dtype():
    # bf16 elementwise/softmax chain only on chips with bf16 VPU/EUP.
    try:
        kind = jax.devices()[0].device_kind.lower()
    except Exception:
        return jnp.float32
    if any(t in kind for t in ("v2", "v3", "v4", "v5")):
        return jnp.float32
    return jnp.bfloat16


def make_scaled_dot_product_attention(d_k, enc_dec_flag=True,
                                      activation_fun="softmax"):
    scale = 1.0 / math.sqrt(d_k)

    def forward(Q, K, V, attn_mask_col, adj_matrix=None, dist_matrix=None,
                conv_w=None, conv_b=None, block_q=None, need_attn=True,
                elementwise_dtype=None):
        B, H, Lq, Dk = Q.shape
        Lk = K.shape[2]
        Dv = V.shape[3]

        ew = (elementwise_dtype if elementwise_dtype is not None
              else _default_elementwise_dtype())
        ew_bytes = jnp.dtype(ew).itemsize

        # ------- inputs: bf16 MXU feeds, int8 mask, pad Lk to lane multiple.
        Lk_pad = _round_up(Lk, 128)
        mask_i8 = (attn_mask_col != 0).astype(jnp.int8)
        Hm = mask_i8.shape[1]                       # 1 if head-broadcast
        assert Hm in (1, H)

        if enc_dec_flag:
            if adj_matrix is None:
                adj_matrix = jnp.zeros((B, 1, Lq, Lk), jnp.bfloat16)
            if dist_matrix is None:
                dist_matrix = jnp.zeros((B, 1, Lq, Lk), jnp.bfloat16)
            adj_b = adj_matrix.astype(jnp.bfloat16)
            dist_b = dist_matrix.astype(jnp.bfloat16)
            Ha, Hd = adj_b.shape[1], dist_b.shape[1]
            assert Ha in (1, H) and Hd in (1, H)
            if conv_w is None:
                conv_w = jnp.zeros((3,), jnp.float32)
            if conv_b is None:
                conv_b = jnp.zeros((1,), jnp.float32)
            conv_w = jnp.asarray(conv_w, jnp.float32).reshape(3)
            conv_b = jnp.asarray(conv_b, jnp.float32).reshape(1)
        else:
            Ha = Hd = 1

        # ------- block_q + K/V buffer depth from an explicit VMEM budget.
        budget = _vmem_budget_bytes()

        def footprint(bq, kv_bufs):
            pipe = 2 * H * bq * Dk * 2                     # Q (bf16, 2 bufs)
            pipe += kv_bufs * H * Lk_pad * (Dk + Dv) * 2   # K, V (bf16)
            pipe += 2 * Hm * bq * Lk_pad * 1               # mask (int8)
            if enc_dec_flag:
                pipe += 2 * (Ha + Hd) * bq * Lk_pad * 2    # adj, dist (bf16)
            pipe += 2 * bq * H * Dv * 4                    # ctx out (f32)
            if need_attn:
                pipe += 2 * H * bq * Lk_pad * 2            # attn out (bf16)
            # In-kernel temporaries: bias plane + ~4 live per-head Lq x Lk
            # planes (f32-conservative) + per-head ctx tiles held until the
            # final lane-dense concat/store.
            interm = (Hm * bq * Lk_pad * ew_bytes
                      + 4 * bq * Lk_pad * 4
                      + H * bq * Dv * 4)
            return pipe + interm

        if block_q is None:
            max_bq = _round_up(min(Lq, 1024), 32)
            if B == 1 and Lq > 32:
                # Keep >= 2 grid steps so both v7x TensorCores get work.
                max_bq = min(max_bq, _round_up(pl.cdiv(Lq, 2), 32))
            cands = [max_bq] + [c for c in (512, 256, 128, 64, 32)
                                if c < max_bq]
            block_q, kv_bufs = cands[-1], 1                # best-effort floor
            for bq in cands:
                if footprint(bq, 2) <= budget:
                    block_q, kv_bufs = bq, 2
                    break
                if pl.cdiv(Lq, bq) > 1 and footprint(bq, 1) <= budget:
                    block_q, kv_bufs = bq, 1
                    break
        else:
            block_q = _round_up(block_q, 32)
            kv_bufs = 2 if footprint(block_q, 2) <= budget else 1

        Lq_pad = _round_up(Lq, block_q)
        nq = Lq_pad // block_q

        # ------- pad + cast (scale is fused with the bf16 cast XLA-side).
        Qb = jnp.pad((Q * scale).astype(jnp.bfloat16),
                     ((0, 0), (0, 0), (0, Lq_pad - Lq), (0, 0)))
        Kb = jnp.pad(K.astype(jnp.bfloat16),
                     ((0, 0), (0, 0), (0, Lk_pad - Lk), (0, 0)))
        Vb = jnp.pad(V.astype(jnp.bfloat16),
                     ((0, 0), (0, 0), (0, Lk_pad - Lk), (0, 0)))
        # Padded query rows are sliced off; padded key columns are masked
        # (pad value 1 -> additive -1e9 bias).
        mask_p = jnp.pad(mask_i8,
                         ((0, 0), (0, 0), (0, Lq_pad - Lq), (0, Lk_pad - Lk)),
                         constant_values=1)
        if enc_dec_flag:
            pads = ((0, 0), (0, 0), (0, Lq_pad - Lq), (0, Lk_pad - Lk))
            adj_p = jnp.pad(adj_b, pads)
            dist_p = jnp.pad(dist_b, pads)

        # ------- kernel -----------------------------------------------------
        def act(x):
            if activation_fun == "softmax":
                m = jnp.max(x, axis=-1, keepdims=True)
                e = jnp.exp(x - m)                                     # EUP
                s = jnp.sum(e.astype(jnp.float32), axis=-1, keepdims=True)
                return e * pl.reciprocal(s, approx=True).astype(x.dtype)
            elif activation_fun == "relu":
                return jnp.maximum(x, 0.0)
            elif activation_fun == "sigmoid":
                return jax.nn.sigmoid(x)
            raise ValueError(activation_fun)

        def kernel(*refs):
            i = 0
            if enc_dec_flag:
                w_ref, b_ref = refs[0], refs[1]
                i = 2
            q_ref, k_ref, v_ref, m_ref = refs[i:i + 4]
            i += 4
            if enc_dec_flag:
                adj_ref, dist_ref = refs[i:i + 2]
                i += 2
            ctx_ref = refs[i]
            attn_ref = refs[i + 1] if need_attn else None

            # Additive {0, NEG} mask bias, built once per block, reused by
            # both masking steps.
            bias = (m_ref[...].astype(jnp.float32) * NEG).astype(ew)

            ctx_parts = []
            for h in range(H):                 # unrolled; H is small
                bias_h = bias[0 if Hm == 1 else h]
                q_h = q_ref[h]                 # (bq, Dk)      bf16, pre-scaled
                k_h = k_ref[h]                 # (Lk_pad, Dk)  bf16
                v_h = v_ref[h]                 # (Lk_pad, Dv)  bf16

                # scores = (Q/sqrt(dk)) @ K^T : MXU, f32 accumulation, no
                # materialized transpose (contract both last dims).
                s = lax.dot_general(q_h, k_h, (((1,), (1,)), ((), ())),
                                    preferred_element_type=jnp.float32)
                p = act(s.astype(ew) + bias_h)

                if enc_dec_flag:
                    dist_h = dist_ref[0 if Hd == 1 else h].astype(jnp.float32)
                    adj_h = adj_ref[0 if Ha == 1 else h].astype(jnp.float32)
                    # Conv2d(3->1, 1x1) over channels [scores, dist, adj],
                    # combined in f32 (SMEM scalars are f32).
                    w = (w_ref[0] * p.astype(jnp.float32)
                         + w_ref[1] * dist_h
                         + w_ref[2] * adj_h
                         + b_ref[0])
                    attn_h = act(w.astype(ew) + bias_h)
                else:
                    attn_h = p

                # Single bf16 cast reused for the attn store and attn @ V.
                attn_bf = attn_h.astype(jnp.bfloat16)
                if need_attn:
                    attn_ref[h] = attn_bf
                ctx_parts.append(
                    jnp.dot(attn_bf, v_h, preferred_element_type=jnp.float32))

            # Lane-dense ctx store: one unmasked (bq, H*Dv) vst stream.
            ctx_ref[...] = jnp.concatenate(ctx_parts, axis=-1).astype(
                ctx_ref.dtype)

        # ------- specs / pallas_call ----------------------------------------
        sq = pl.Squeezed()
        q_spec = pl.BlockSpec((sq, H, block_q, Dk),
                              lambda b, qi: (b, 0, qi, 0))
        if kv_bufs == 2:
            k_spec = pl.BlockSpec((sq, H, Lk_pad, Dk),
                                  lambda b, qi: (b, 0, 0, 0))
            v_spec = pl.BlockSpec((sq, H, Lk_pad, Dv),
                                  lambda b, qi: (b, 0, 0, 0))
        else:
            # K/V are constant across qi: single-buffer them to reclaim VMEM
            # (prefetch overlap is only lost at b-boundaries).
            k_spec = pl.BlockSpec((sq, H, Lk_pad, Dk),
                                  lambda b, qi: (b, 0, 0, 0),
                                  pipeline_mode=pl.Buffered(1))
            v_spec = pl.BlockSpec((sq, H, Lk_pad, Dv),
                                  lambda b, qi: (b, 0, 0, 0),
                                  pipeline_mode=pl.Buffered(1))
        m_spec = pl.BlockSpec((sq, Hm, block_q, Lk_pad),
                              lambda b, qi: (b, 0, qi, 0))
        ctx_spec = pl.BlockSpec((sq, block_q, H * Dv),
                                lambda b, qi: (b, qi, 0))
        attn_spec = pl.BlockSpec((sq, H, block_q, Lk_pad),
                                 lambda b, qi: (b, 0, qi, 0))
        smem_spec = pl.BlockSpec(memory_space=pltpu.MemorySpace.SMEM)

        if enc_dec_flag:
            adj_spec = pl.BlockSpec((sq, Ha, block_q, Lk_pad),
                                    lambda b, qi: (b, 0, qi, 0))
            dist_spec = pl.BlockSpec((sq, Hd, block_q, Lk_pad),
                                     lambda b, qi: (b, 0, qi, 0))
            in_specs = [smem_spec, smem_spec, q_spec, k_spec, v_spec, m_spec,
                        adj_spec, dist_spec]
            inputs = (conv_w, conv_b, Qb, Kb, Vb, mask_p, adj_p, dist_p)
        else:
            in_specs = [q_spec, k_spec, v_spec, m_spec]
            inputs = (Qb, Kb, Vb, mask_p)

        ctx_shape = jax.ShapeDtypeStruct((B, Lq_pad, H * Dv), Q.dtype)
        if need_attn:
            out_shape = (ctx_shape,
                         jax.ShapeDtypeStruct((B, H, Lq_pad, Lk_pad),
                                              jnp.bfloat16))
            out_specs = (ctx_spec, attn_spec)
        else:
            out_shape = ctx_shape
            out_specs = ctx_spec

        need = footprint(block_q, kv_bufs)
        vmem_limit = int(min(budget, max(32 << 20, need + (8 << 20))))

        out = pl.pallas_call(
            kernel,
            out_shape=out_shape,
            grid=(B, nq),
            in_specs=in_specs,
            out_specs=out_specs,
            compiler_params=pltpu.CompilerParams(
                dimension_semantics=("parallel", "parallel"),
                vmem_limit_bytes=vmem_limit),
        )(*inputs)

        if need_attn:
            ctx_dense, attn_p = out
        else:
            ctx_dense, attn_p = out, None

        # (B, Lq_pad, H*Dv) lane-dense -> (B, H, Lq, Dv).
        ctx = ctx_dense.reshape(B, Lq_pad, H, Dv).transpose(0, 2, 1, 3)
        ctx = ctx[:, :, :Lq, :]
        attn = attn_p[:, :, :Lq, :Lk] if need_attn else None
        return ctx, attn

    return forward


if __name__ == "__main__":
    # ---- Test 1: enc_dec branch (softmax + fused 1x1 conv over adj/dist) ---
    B, H, L, D_K, D_V = 2, 4, 16, 32, 32

    key = jax.random.PRNGKey(0)
    kq, kk, kv, km, ka, kd, kw, kb = jax.random.split(key, 8)

    Q = jax.random.normal(kq, (B, H, L, D_K), jnp.float32)
    K = jax.random.normal(kk, (B, H, L, D_K), jnp.float32)
    V = jax.random.normal(kv, (B, H, L, D_V), jnp.float32)
    attn_mask_col = jax.random.bernoulli(km, 0.2, (B, H, L, L))
    adj_matrix = jax.random.bernoulli(ka, 0.3, (B, H, L, L)).astype(jnp.float32)
    dist_matrix = jax.random.uniform(kd, (B, H, L, L), jnp.float32)
    conv_w = jax.random.normal(kw, (1, 3, 1, 1), jnp.float32) * 0.1
    conv_b = jax.random.normal(kb, (1,), jnp.float32) * 0.1

    attention = make_scaled_dot_product_attention(
        d_k=D_K, enc_dec_flag=True, activation_fun="softmax")
    context, attn = attention(Q, K, V, attn_mask_col,
                              adj_matrix=adj_matrix, dist_matrix=dist_matrix,
                              conv_w=conv_w, conv_b=conv_b)
    jax.block_until_ready((context, attn))
    assert context.shape == (B, H, L, D_V)
    assert attn.shape == (B, H, L, L)

    def ref(Q, K, V, mask, adj, dist, w, b):
        sc = jnp.einsum("bhqd,bhkd->bhqk", Q, K) / math.sqrt(D_K)
        sc = jnp.where(mask, NEG, sc)
        sc = jax.nn.softmax(sc, axis=-1)
        ws = (w[0, 0, 0, 0] * sc + w[0, 1, 0, 0] * dist
              + w[0, 2, 0, 0] * adj + b[0])
        ws = jnp.where(mask, NEG, ws)
        at = jax.nn.softmax(ws, axis=-1)
        return jnp.einsum("bhqk,bhkd->bhqd", at, V), at

    ctx_ref, attn_ref_ = ref(Q, K, V, attn_mask_col, adj_matrix, dist_matrix,
                             conv_w, conv_b)
    assert float(jnp.max(jnp.abs(context.astype(jnp.float32) - ctx_ref))) < 0.1
    assert float(jnp.max(jnp.abs(attn.astype(jnp.float32) - attn_ref_))) < 0.04

    # ---- Test 2: no-conv branch, B=1 (split-Lq grid), ctx-only output ------
    B2, H2, L2 = 1, 4, 80
    k2 = jax.random.split(jax.random.PRNGKey(1), 4)
    Q2 = jax.random.normal(k2[0], (B2, H2, L2, D_K), jnp.float32)
    K2 = jax.random.normal(k2[1], (B2, H2, L2, D_K), jnp.float32)
    V2 = jax.random.normal(k2[2], (B2, H2, L2, D_V), jnp.float32)
    mask2 = jax.random.bernoulli(k2[3], 0.2, (B2, 1, L2, L2))

    attention2 = make_scaled_dot_product_attention(
        d_k=D_K, enc_dec_flag=False, activation_fun="softmax")
    ctx2, attn2 = attention2(Q2, K2, V2, mask2, need_attn=False)
    jax.block_until_ready(ctx2)
    assert ctx2.shape == (B2, H2, L2, D_V) and attn2 is None

    sc2 = jnp.einsum("bhqd,bhkd->bhqk", Q2, K2) / math.sqrt(D_K)
    sc2 = jnp.where(mask2, NEG, sc2)
    at2 = jax.nn.softmax(sc2, axis=-1)
    ctx2_ref = jnp.einsum("bhqk,bhkd->bhqd", at2, V2)
    assert float(jnp.max(jnp.abs(ctx2.astype(jnp.float32) - ctx2_ref))) < 0.15

    print("KERNEL_OK")
</pallas_src>

<mosaic_0001>
module attributes {stable_mosaic.version = 11 : i64} {
  func.func @kernel(%arg0: i32, %arg1: i32, %arg2: memref<3xf32, #tpu.memory_space<smem>>, %arg3: memref<1xf32, #tpu.memory_space<smem>>, %arg4: memref<1x4x32x32xbf16, #tpu.memory_space<vmem>>, %arg5: memref<1x4x128x32xbf16, #tpu.memory_space<vmem>>, %arg6: memref<1x4x128x32xbf16, #tpu.memory_space<vmem>>, %arg7: memref<1x4x32x128xi8, #tpu.memory_space<vmem>>, %arg8: memref<1x4x32x128xbf16, #tpu.memory_space<vmem>>, %arg9: memref<1x4x32x128xbf16, #tpu.memory_space<vmem>>, %arg10: memref<1x32x128xf32, #tpu.memory_space<vmem>>, %arg11: memref<1x4x32x128xbf16, #tpu.memory_space<vmem>>) attributes {dimension_semantics = [#tpu.dimension_semantics<parallel>, #tpu.dimension_semantics<parallel>], iteration_bounds = array<i64: 2, 1>, scalar_prefetch = 0 : i64, scratch_operands = 0 : i64, tpu.core_type = #tpu.core_type<tc>, window_params = [{transform_indices = @transform_0, window_bounds = array<i64: 3>}, {transform_indices = @transform_1, window_bounds = array<i64: 1>}, {transform_indices = @transform_2, window_bounds = array<i64: 1, 4, 32, 32>}, {transform_indices = @transform_3, window_bounds = array<i64: 1, 4, 128, 32>}, {transform_indices = @transform_4, window_bounds = array<i64: 1, 4, 128, 32>}, {transform_indices = @transform_5, window_bounds = array<i64: 1, 4, 32, 128>}, {transform_indices = @transform_6, window_bounds = array<i64: 1, 4, 32, 128>}, {transform_indices = @transform_7, window_bounds = array<i64: 1, 4, 32, 128>}, {transform_indices = @transform_8, window_bounds = array<i64: 1, 32, 128>}, {transform_indices = @transform_9, window_bounds = array<i64: 1, 4, 32, 128>}]} {
    %c0 = arith.constant 0 : index
    %c0_0 = arith.constant 0 : index
    %c0_1 = arith.constant 0 : index
    %c0_2 = arith.constant 0 : index
    %0 = vector.load %arg7[%c0, %c0_0, %c0_1, %c0_2] : memref<1x4x32x128xi8, #tpu.memory_space<vmem>>, vector<1x4x32x128xi8>
    %1 = vector.shape_cast %0 : vector<1x4x32x128xi8> to vector<4x32x128xi8>
    %2 = arith.sitofp %1 : vector<4x32x128xi8> to vector<4x32x128xf32>
    %cst = arith.constant -1.000000e+09 : f32
    %3 = vector.broadcast %cst : f32 to vector<4x32x128xf32>
    %4 = arith.mulf %2, %3 : vector<4x32x128xf32>
    %5 = arith.truncf %4 : vector<4x32x128xf32> to vector<4x32x128xbf16>
    %6 = vector.extract_strided_slice %5 {offsets = [0, 0, 0], sizes = [1, 32, 128], strides = [1, 1, 1]} : vector<4x32x128xbf16> to vector<1x32x128xbf16>
    %7 = vector.shape_cast %6 : vector<1x32x128xbf16> to vector<32x128xbf16>
    %c0_3 = arith.constant 0 : index
    %c0_4 = arith.constant 0 : index
    %c0_5 = arith.constant 0 : index
    %c0_6 = arith.constant 0 : index
    %8 = vector.load %arg4[%c0_3, %c0_4, %c0_5, %c0_6] : memref<1x4x32x32xbf16, #tpu.memory_space<vmem>>, vector<1x1x32x32xbf16>
    %9 = vector.shape_cast %8 : vector<1x1x32x32xbf16> to vector<32x32xbf16>
    %c0_7 = arith.constant 0 : index
    %c0_8 = arith.constant 0 : index
    %c0_9 = arith.constant 0 : index
    %c0_10 = arith.constant 0 : index
    %10 = vector.load %arg5[%c0_7, %c0_8, %c0_9, %c0_10] : memref<1x4x128x32xbf16, #tpu.memory_space<vmem>>, vector<1x1x128x32xbf16>
    %11 = vector.shape_cast %10 : vector<1x1x128x32xbf16> to vector<128x32xbf16>
    %c0_11 = arith.constant 0 : index
    %c0_12 = arith.constant 0 : index
    %c0_13 = arith.constant 0 : index
    %c0_14 = arith.constant 0 : index
    %12 = vector.load %arg6[%c0_11, %c0_12, %c0_13, %c0_14] : memref<1x4x128x32xbf16, #tpu.memory_space<vmem>>, vector<1x1x128x32xbf16>
    %13 = vector.shape_cast %12 : vector<1x1x128x32xbf16> to vector<128x32xbf16>
    %cst_15 = arith.constant dense<0.000000e+00> : vector<32x128xf32>
    %14 = tpu.matmul %9, %11, %cst_15 {dimension_numbers = #tpu.dot_dimension_numbers<[1], [1], [0], [0], [0, 0, 1, 0], [], []>} : vector<32x32xbf16>, vector<128x32xbf16>, vector<32x128xf32> -> vector<32x128xf32>
    %15 = arith.truncf %14 : vector<32x128xf32> to vector<32x128xbf16>
    %16 = arith.addf %15, %7 : vector<32x128xbf16>
    %cst_16 = arith.constant dense<0xFF80> : vector<32xbf16>
    %17 = vector.multi_reduction <maximumf>, %16, %cst_16 [1] : vector<32x128xbf16> to vector<32xbf16>
    %18 = vector.shape_cast %17 : vector<32xbf16> to vector<32x1xbf16>
    %19 = vector.broadcast %18 : vector<32x1xbf16> to vector<32x128xbf16>
    %20 = arith.subf %16, %19 : vector<32x128xbf16>
    %21 = math.exp %20 : vector<32x128xbf16>
    %22 = arith.extf %21 : vector<32x128xbf16> to vector<32x128xf32>
    %cst_17 = arith.constant dense<0.000000e+00> : vector<32xf32>
    %23 = vector.multi_reduction <add>, %22, %cst_17 [1] : vector<32x128xf32> to vector<32xf32>
    %24 = vector.shape_cast %23 : vector<32xf32> to vector<32x1xf32>
    %25 = tpu.reciprocal %24 {approx = true} : vector<32x1xf32> -> vector<32x1xf32>
    %26 = arith.truncf %25 : vector<32x1xf32> to vector<32x1xbf16>
    %27 = vector.broadcast %26 : vector<32x1xbf16> to vector<32x128xbf16>
    %28 = arith.mulf %21, %27 : vector<32x128xbf16>
    %c0_18 = arith.constant 0 : index
    %c0_19 = arith.constant 0 : index
    %c0_20 = arith.constant 0 : index
    %c0_21 = arith.constant 0 : index
    %29 = vector.load %arg9[%c0_18, %c0_19, %c0_20, %c0_21] : memref<1x4x32x128xbf16, #tpu.memory_space<vmem>>, vector<1x1x32x128xbf16>
    %30 = vector.shape_cast %29 : vector<1x1x32x128xbf16> to vector<32x128xbf16>
    %31 = arith.extf %30 : vector<32x128xbf16> to vector<32x128xf32>
    %c0_22 = arith.constant 0 : index
    %c0_23 = arith.constant 0 : index
    %c0_24 = arith.constant 0 : index
    %c0_25 = arith.constant 0 : index
    %32 = vector.load %arg8[%c0_22, %c0_23, %c0_24, %c0_25] : memref<1x4x32x128xbf16, #tpu.memory_space<vmem>>, vector<1x1x32x128xbf16>
    %33 = vector.shape_cast %32 : vector<1x1x32x128xbf16> to vector<32x128xbf16>
    %34 = arith.extf %33 : vector<32x128xbf16> to vector<32x128xf32>
    %c0_26 = arith.constant 0 : index
    %35 = memref.load %arg2[%c0_26] : memref<3xf32, #tpu.memory_space<smem>>
    %36 = arith.extf %28 : vector<32x128xbf16> to vector<32x128xf32>
    %37 = vector.broadcast %35 : f32 to vector<32x128xf32>
    %38 = arith.mulf %37, %36 : vector<32x128xf32>
    %c1 = arith.constant 1 : index
    %39 = memref.load %arg2[%c1] : memref<3xf32, #tpu.memory_space<smem>>
    %40 = vector.broadcast %39 : f32 to vector<32x128xf32>
    %41 = arith.mulf %40, %31 : vector<32x128xf32>
    %42 = arith.addf %38, %41 : vector<32x128xf32>
    %c2 = arith.constant 2 : index
    %43 = memref.load %arg2[%c2] : memref<3xf32, #tpu.memory_space<smem>>
    %44 = vector.broadcast %43 : f32 to vector<32x128xf32>
    %45 = arith.mulf %44, %34 : vector<32x128xf32>
    %46 = arith.addf %42, %45 : vector<32x128xf32>
    %c0_27 = arith.constant 0 : index
    %47 = memref.load %arg3[%c0_27] : memref<1xf32, #tpu.memory_space<smem>>
    %48 = vector.broadcast %47 : f32 to vector<32x128xf32>
    %49 = arith.addf %46, %48 : vector<32x128xf32>
    %50 = arith.truncf %49 : vector<32x128xf32> to vector<32x128xbf16>
    %51 = arith.addf %50, %7 : vector<32x128xbf16>
    %cst_28 = arith.constant dense<0xFF80> : vector<32xbf16>
    %52 = vector.multi_reduction <maximumf>, %51, %cst_28 [1] : vector<32x128xbf16> to vector<32xbf16>
    %53 = vector.shape_cast %52 : vector<32xbf16> to vector<32x1xbf16>
    %54 = vector.broadcast %53 : vector<32x1xbf16> to vector<32x128xbf16>
    %55 = arith.subf %51, %54 : vector<32x128xbf16>
    %56 = math.exp %55 : vector<32x128xbf16>
    %57 = arith.extf %56 : vector<32x128xbf16> to vector<32x128xf32>
    %cst_29 = arith.constant dense<0.000000e+00> : vector<32xf32>
    %58 = vector.multi_reduction <add>, %57, %cst_29 [1] : vector<32x128xf32> to vector<32xf32>
    %59 = vector.shape_cast %58 : vector<32xf32> to vector<32x1xf32>
    %60 = tpu.reciprocal %59 {approx = true} : vector<32x1xf32> -> vector<32x1xf32>
    %61 = arith.truncf %60 : vector<32x1xf32> to vector<32x1xbf16>
    %62 = vector.broadcast %61 : vector<32x1xbf16> to vector<32x128xbf16>
    %63 = arith.mulf %56, %62 : vector<32x128xbf16>
    %c0_30 = arith.constant 0 : index
    %c0_31 = arith.constant 0 : index
    %c0_32 = arith.constant 0 : index
    %c0_33 = arith.constant 0 : index
    %64 = vector.load %arg11[%c0_30, %c0_31, %c0_32, %c0_33] : memref<1x4x32x128xbf16, #tpu.memory_space<vmem>>, vector<1x1x32x128xbf16>
    %65 = vector.shape_cast %64 : vector<1x1x32x128xbf16> to vector<32x128xbf16>
    %66 = vector.shape_cast %63 : vector<32x128xbf16> to vector<1x1x32x128xbf16>
    tpu.vector_store %arg11[%c0_30, %c0_31, %c0_32, %c0_33], %66 {strides = array<i32>} : memref<1x4x32x128xbf16, #tpu.memory_space<vmem>>, vector<1x1x32x128xbf16>,
    %cst_34 = arith.constant dense<0.000000e+00> : vector<32x32xf32>
    %67 = tpu.matmul %63, %13, %cst_34 {dimension_numbers = #tpu.dot_dimension_numbers<[1], [0], [0], [1], [0, 0, 1, 1], [], []>} : vector<32x128xbf16>, vector<128x32xbf16>, vector<32x32xf32> -> vector<32x32xf32>
    %68 = vector.extract_strided_slice %5 {offsets = [1, 0, 0], sizes = [1, 32, 128], strides = [1, 1, 1]} : vector<4x32x128xbf16> to vector<1x32x128xbf16>
    %69 = vector.shape_cast %68 : vector<1x32x128xbf16> to vector<32x128xbf16>
    %c0_35 = arith.constant 0 : index
    %c1_36 = arith.constant 1 : index
    %c0_37 = arith.constant 0 : index
    %c0_38 = arith.constant 0 : index
    %70 = vector.load %arg4[%c0_35, %c1_36, %c0_37, %c0_38] : memref<1x4x32x32xbf16, #tpu.memory_space<vmem>>, vector<1x1x32x32xbf16>
    %71 = vector.shape_cast %70 : vector<1x1x32x32xbf16> to vector<32x32xbf16>
    %c0_39 = arith.constant 0 : index
    %c1_40 = arith.constant 1 : index
    %c0_41 = arith.constant 0 : index
    %c0_42 = arith.constant 0 : index
    %72 = vector.load %arg5[%c0_39, %c1_40, %c0_41, %c0_42] : memref<1x4x128x32xbf16, #tpu.memory_space<vmem>>, vector<1x1x128x32xbf16>
    %73 = vector.shape_cast %72 : vector<1x1x128x32xbf16> to vector<128x32xbf16>
    %c0_43 = arith.constant 0 : index
    %c1_44 = arith.constant 1 : index
    %c0_45 = arith.constant 0 : index
    %c0_46 = arith.constant 0 : index
    %74 = vector.load %arg6[%c0_43, %c1_44, %c0_45, %c0_46] : memref<1x4x128x32xbf16, #tpu.memory_space<vmem>>, vector<1x1x128x32xbf16>
    %75 = vector.shape_cast %74 : vector<1x1x128x32xbf16> to vector<128x32xbf16>
    %cst_47 = arith.constant dense<0.000000e+00> : vector<32x128xf32>
    %76 = tpu.matmul %71, %73, %cst_47 {dimension_numbers = #tpu.dot_dimension_numbers<[1], [1], [0], [0], [0, 0, 1, 0], [], []>} : vector<32x32xbf16>, vector<128x32xbf16>, vector<32x128xf32> -> vector<32x128xf32>
    %77 = arith.truncf %76 : vector<32x128xf32> to vector<32x128xbf16>
    %78 = arith.addf %77, %69 : vector<32x128xbf16>
    %cst_48 = arith.constant dense<0xFF80> : vector<32xbf16>
    %79 = vector.multi_reduction <maximumf>, %78, %cst_48 [1] : vector<32x128xbf16> to vector<32xbf16>
    %80 = vector.shape_cast %79 : vector<32xbf16> to vector<32x1xbf16>
    %81 = vector.broadcast %80 : vector<32x1xbf16> to vector<32x128xbf16>
    %82 = arith.subf %78, %81 : vector<32x128xbf16>
    %83 = math.exp %82 : vector<32x128xbf16>
    %84 = arith.extf %83 : vector<32x128xbf16> to vector<32x128xf32>
    %cst_49 = arith.constant dense<0.000000e+00> : vector<32xf32>
    %85 = vector.multi_reduction <add>, %84, %cst_49 [1] : vector<32x128xf32> to vector<32xf32>
    %86 = vector.shape_cast %85 : vector<32xf32> to vector<32x1xf32>
    %87 = tpu.reciprocal %86 {approx = true} : vector<32x1xf32> -> vector<32x1xf32>
    %88 = arith.truncf %87 : vector<32x1xf32> to vector<32x1xbf16>
    %89 = vector.broadcast %88 : vector<32x1xbf16> to vector<32x128xbf16>
    %90 = arith.mulf %83, %89 : vector<32x128xbf16>
    %c0_50 = arith.constant 0 : index
    %c1_51 = arith.constant 1 : index
    %c0_52 = arith.constant 0 : index
    %c0_53 = arith.constant 0 : index
    %91 = vector.load %arg9[%c0_50, %c1_51, %c0_52, %c0_53] : memref<1x4x32x128xbf16, #tpu.memory_space<vmem>>, vector<1x1x32x128xbf16>
    %92 = vector.shape_cast %91 : vector<1x1x32x128xbf16> to vector<32x128xbf16>
    %93 = arith.extf %92 : vector<32x128xbf16> to vector<32x128xf32>
    %c0_54 = arith.constant 0 : index
    %c1_55 = arith.constant 1 : index
    %c0_56 = arith.constant 0 : index
    %c0_57 = arith.constant 0 : index
    %94 = vector.load %arg8[%c0_54, %c1_55, %c0_56, %c0_57] : memref<1x4x32x128xbf16, #tpu.memory_space<vmem>>, vector<1x1x32x128xbf16>
    %95 = vector.shape_cast %94 : vector<1x1x32x128xbf16> to vector<32x128xbf16>
    %96 = arith.extf %95 : vector<32x128xbf16> to vector<32x128xf32>
    %c0_58 = arith.constant 0 : index
    %97 = memref.load %arg2[%c0_58] : memref<3xf32, #tpu.memory_space<smem>>
    %98 = arith.extf %90 : vector<32x128xbf16> to vector<32x128xf32>
    %99 = vector.broadcast %97 : f32 to vector<32x128xf32>
    %100 = arith.mulf %99, %98 : vector<32x128xf32>
    %c1_59 = arith.constant 1 : index
    %101 = memref.load %arg2[%c1_59] : memref<3xf32, #tpu.memory_space<smem>>
    %102 = vector.broadcast %101 : f32 to vector<32x128xf32>
    %103 = arith.mulf %102, %93 : vector<32x128xf32>
    %104 = arith.addf %100, %103 : vector<32x128xf32>
    %c2_60 = arith.constant 2 : index
    %105 = memref.load %arg2[%c2_60] : memref<3xf32, #tpu.memory_space<smem>>
    %106 = vector.broadcast %105 : f32 to vector<32x128xf32>
    %107 = arith.mulf %106, %96 : vector<32x128xf32>
    %108 = arith.addf %104, %107 : vector<32x128xf32>
    %c0_61 = arith.constant 0 : index
    %109 = memref.load %arg3[%c0_61] : memref<1xf32, #tpu.memory_space<smem>>
    %110 = vector.broadcast %109 : f32 to vector<32x128xf32>
    %111 = arith.addf %108, %110 : vector<32x128xf32>
    %112 = arith.truncf %111 : vector<32x128xf32> to vector<32x128xbf16>
    %113 = arith.addf %112, %69 : vector<32x128xbf16>
    %cst_62 = arith.constant dense<0xFF80> : vector<32xbf16>
    %114 = vector.multi_reduction <maximumf>, %113, %cst_62 [1] : vector<32x128xbf16> to vector<32xbf16>
    %115 = vector.shape_cast %114 : vector<32xbf16> to vector<32x1xbf16>
    %116 = vector.broadcast %115 : vector<32x1xbf16> to vector<32x128xbf16>
    %117 = arith.subf %113, %116 : vector<32x128xbf16>
    %118 = math.exp %117 : vector<32x128xbf16>
    %119 = arith.extf %118 : vector<32x128xbf16> to vector<32x128xf32>
    %cst_63 = arith.constant dense<0.000000e+00> : vector<32xf32>
    %120 = vector.multi_reduction <add>, %119, %cst_63 [1] : vector<32x128xf32> to vector<32xf32>
    %121 = vector.shape_cast %120 : vector<32xf32> to vector<32x1xf32>
    %122 = tpu.reciprocal %121 {approx = true} : vector<32x1xf32> -> vector<32x1xf32>
    %123 = arith.truncf %122 : vector<32x1xf32> to vector<32x1xbf16>
    %124 = vector.broadcast %123 : vector<32x1xbf16> to vector<32x128xbf16>
    %125 = arith.mulf %118, %124 : vector<32x128xbf16>
    %c0_64 = arith.constant 0 : index
    %c1_65 = arith.constant 1 : index
    %c0_66 = arith.constant 0 : index
    %c0_67 = arith.constant 0 : index
    %126 = vector.load %arg11[%c0_64, %c1_65, %c0_66, %c0_67] : memref<1x4x32x128xbf16, #tpu.memory_space<vmem>>, vector<1x1x32x128xbf16>
    %127 = vector.shape_cast %126 : vector<1x1x32x128xbf16> to vector<32x128xbf16>
    %128 = vector.shape_cast %125 : vector<32x128xbf16> to vector<1x1x32x128xbf16>
    tpu.vector_store %arg11[%c0_64, %c1_65, %c0_66, %c0_67], %128 {strides = array<i32>} : memref<1x4x32x128xbf16, #tpu.memory_space<vmem>>, vector<1x1x32x128xbf16>,
    %cst_68 = arith.constant dense<0.000000e+00> : vector<32x32xf32>
    %129 = tpu.matmul %125, %75, %cst_68 {dimension_numbers = #tpu.dot_dimension_numbers<[1], [0], [0], [1], [0, 0, 1, 1], [], []>} : vector<32x128xbf16>, vector<128x32xbf16>, vector<32x32xf32> -> vector<32x32xf32>
    %130 = vector.extract_strided_slice %5 {offsets = [2, 0, 0], sizes = [1, 32, 128], strides = [1, 1, 1]} : vector<4x32x128xbf16> to vector<1x32x128xbf16>
    %131 = vector.shape_cast %130 : vector<1x32x128xbf16> to vector<32x128xbf16>
    %c0_69 = arith.constant 0 : index
    %c2_70 = arith.constant 2 : index
    %c0_71 = arith.constant 0 : index
    %c0_72 = arith.constant 0 : index
    %132 = vector.load %arg4[%c0_69, %c2_70, %c0_71, %c0_72] : memref<1x4x32x32xbf16, #tpu.memory_space<vmem>>, vector<1x1x32x32xbf16>
    %133 = vector.shape_cast %132 : vector<1x1x32x32xbf16> to vector<32x32xbf16>
    %c0_73 = arith.constant 0 : index
    %c2_74 = arith.constant 2 : index
    %c0_75 = arith.constant 0 : index
    %c0_76 = arith.constant 0 : index
    %134 = vector.load %arg5[%c0_73, %c2_74, %c0_75, %c0_76] : memref<1x4x128x32xbf16, #tpu.memory_space<vmem>>, vector<1x1x128x32xbf16>
    %135 = vector.shape_cast %134 : vector<1x1x128x32xbf16> to vector<128x32xbf16>
    %c0_77 = arith.constant 0 : index
    %c2_78 = arith.constant 2 : index
    %c0_79 = arith.constant 0 : index
    %c0_80 = arith.constant 0 : index
    %136 = vector.load %arg6[%c0_77, %c2_78, %c0_79, %c0_80] : memref<1x4x128x32xbf16, #tpu.memory_space<vmem>>, vector<1x1x128x32xbf16>
    %137 = vector.shape_cast %136 : vector<1x1x128x32xbf16> to vector<128x32xbf16>
    %cst_81 = arith.constant dense<0.000000e+00> : vector<32x128xf32>
    %138 = tpu.matmul %133, %135, %cst_81 {dimension_numbers = #tpu.dot_dimension_numbers<[1], [1], [0], [0], [0, 0, 1, 0], [], []>} : vector<32x32xbf16>, vector<128x32xbf16>, vector<32x128xf32> -> vector<32x128xf32>
    %139 = arith.truncf %138 : vector<32x128xf32> to vector<32x128xbf16>
    %140 = arith.addf %139, %131 : vector<32x128xbf16>
    %cst_82 = arith.constant dense<0xFF80> : vector<32xbf16>
    %141 = vector.multi_reduction <maximumf>, %140, %cst_82 [1] : vector<32x128xbf16> to vector<32xbf16>
    %142 = vector.shape_cast %141 : vector<32xbf16> to vector<32x1xbf16>
    %143 = vector.broadcast %142 : vector<32x1xbf16> to vector<32x128xbf16>
    %144 = arith.subf %140, %143 : vector<32x128xbf16>
    %145 = math.exp %144 : vector<32x128xbf16>
    %146 = arith.extf %145 : vector<32x128xbf16> to vector<32x128xf32>
    %cst_83 = arith.constant dense<0.000000e+00> : vector<32xf32>
    %147 = vector.multi_reduction <add>, %146, %cst_83 [1] : vector<32x128xf32> to vector<32xf32>
    %148 = vector.shape_cast %147 : vector<32xf32> to vector<32x1xf32>
    %149 = tpu.reciprocal %148 {approx = true} : vector<32x1xf32> -> vector<32x1xf32>
    %150 = arith.truncf %149 : vector<32x1xf32> to vector<32x1xbf16>
    %151 = vector.broadcast %150 : vector<32x1xbf16> to vector<32x128xbf16>
    %152 = arith.mulf %145, %151 : vector<32x128xbf16>
    %c0_84 = arith.constant 0 : index
    %c2_85 = arith.constant 2 : index
    %c0_86 = arith.constant 0 : index
    %c0_87 = arith.constant 0 : index
    %153 = vector.load %arg9[%c0_84, %c2_85, %c0_86, %c0_87] : memref<1x4x32x128xbf16, #tpu.memory_space<vmem>>, vector<1x1x32x128xbf16>
    %154 = vector.shape_cast %153 : vector<1x1x32x128xbf16> to vector<32x128xbf16>
    %155 = arith.extf %154 : vector<32x128xbf16> to vector<32x128xf32>
    %c0_88 = arith.constant 0 : index
    %c2_89 = arith.constant 2 : index
    %c0_90 = arith.constant 0 : index
    %c0_91 = arith.constant 0 : index
    %156 = vector.load %arg8[%c0_88, %c2_89, %c0_90, %c0_91] : memref<1x4x32x128xbf16, #tpu.memory_space<vmem>>, vector<1x1x32x128xbf16>
    %157 = vector.shape_cast %156 : vector<1x1x32x128xbf16> to vector<32x128xbf16>
    %158 = arith.extf %157 : vector<32x128xbf16> to vector<32x128xf32>
    %c0_92 = arith.constant 0 : index
    %159 = memref.load %arg2[%c0_92] : memref<3xf32, #tpu.memory_space<smem>>
    %160 = arith.extf %152 : vector<32x128xbf16> to vector<32x128xf32>
    %161 = vector.broadcast %159 : f32 to vector<32x128xf32>
    %162 = arith.mulf %161, %160 : vector<32x128xf32>
    %c1_93 = arith.constant 1 : index
    %163 = memref.load %arg2[%c1_93] : memref<3xf32, #tpu.memory_space<smem>>
    %164 = vector.broadcast %163 : f32 to vector<32x128xf32>
    %165 = arith.mulf %164, %155 : vector<32x128xf32>
    %166 = arith.addf %162, %165 : vector<32x128xf32>
    %c2_94 = arith.constant 2 : index
    %167 = memref.load %arg2[%c2_94] : memref<3xf32, #tpu.memory_space<smem>>
    %168 = vector.broadcast %167 : f32 to vector<32x128xf32>
    %169 = arith.mulf %168, %158 : vector<32x128xf32>
    %170 = arith.addf %166, %169 : vector<32x128xf32>
    %c0_95 = arith.constant 0 : index
    %171 = memref.load %arg3[%c0_95] : memref<1xf32, #tpu.memory_space<smem>>
    %172 = vector.broadcast %171 : f32 to vector<32x128xf32>
    %173 = arith.addf %170, %172 : vector<32x128xf32>
    %174 = arith.truncf %173 : vector<32x128xf32> to vector<32x128xbf16>
    %175 = arith.addf %174, %131 : vector<32x128xbf16>
    %cst_96 = arith.constant dense<0xFF80> : vector<32xbf16>
    %176 = vector.multi_reduction <maximumf>, %175, %cst_96 [1] : vector<32x128xbf16> to vector<32xbf16>
    %177 = vector.shape_cast %176 : vector<32xbf16> to vector<32x1xbf16>
    %178 = vector.broadcast %177 : vector<32x1xbf16> to vector<32x128xbf16>
    %179 = arith.subf %175, %178 : vector<32x128xbf16>
    %180 = math.exp %179 : vector<32x128xbf16>
    %181 = arith.extf %180 : vector<32x128xbf16> to vector<32x128xf32>
    %cst_97 = arith.constant dense<0.000000e+00> : vector<32xf32>
    %182 = vector.multi_reduction <add>, %181, %cst_97 [1] : vector<32x128xf32> to vector<32xf32>
    %183 = vector.shape_cast %182 : vector<32xf32> to vector<32x1xf32>
    %184 = tpu.reciprocal %183 {approx = true} : vector<32x1xf32> -> vector<32x1xf32>
    %185 = arith.truncf %184 : vector<32x1xf32> to vector<32x1xbf16>
    %186 = vector.broadcast %185 : vector<32x1xbf16> to vector<32x128xbf16>
    %187 = arith.mulf %180, %186 : vector<32x128xbf16>
    %c0_98 = arith.constant 0 : index
    %c2_99 = arith.constant 2 : index
    %c0_100 = arith.constant 0 : index
    %c0_101 = arith.constant 0 : index
    %188 = vector.load %arg11[%c0_98, %c2_99, %c0_100, %c0_101] : memref<1x4x32x128xbf16, #tpu.memory_space<vmem>>, vector<1x1x32x128xbf16>
    %189 = vector.shape_cast %188 : vector<1x1x32x128xbf16> to vector<32x128xbf16>
    %190 = vector.shape_cast %187 : vector<32x128xbf16> to vector<1x1x32x128xbf16>
    tpu.vector_store %arg11[%c0_98, %c2_99, %c0_100, %c0_101], %190 {strides = array<i32>} : memref<1x4x32x128xbf16, #tpu.memory_space<vmem>>, vector<1x1x32x128xbf16>,
    %cst_102 = arith.constant dense<0.000000e+00> : vector<32x32xf32>
    %191 = tpu.matmul %187, %137, %cst_102 {dimension_numbers = #tpu.dot_dimension_numbers<[1], [0], [0], [1], [0, 0, 1, 1], [], []>} : vector<32x128xbf16>, vector<128x32xbf16>, vector<32x32xf32> -> vector<32x32xf32>
    %192 = vector.extract_strided_slice %5 {offsets = [3, 0, 0], sizes = [1, 32, 128], strides = [1, 1, 1]} : vector<4x32x128xbf16> to vector<1x32x128xbf16>
    %193 = vector.shape_cast %192 : vector<1x32x128xbf16> to vector<32x128xbf16>
    %c0_103 = arith.constant 0 : index
    %c3 = arith.constant 3 : index
    %c0_104 = arith.constant 0 : index
    %c0_105 = arith.constant 0 : index
    %194 = vector.load %arg4[%c0_103, %c3, %c0_104, %c0_105] : memref<1x4x32x32xbf16, #tpu.memory_space<vmem>>, vector<1x1x32x32xbf16>
    %195 = vector.shape_cast %194 : vector<1x1x32x32xbf16> to vector<32x32xbf16>
    %c0_106 = arith.constant 0 : index
    %c3_107 = arith.constant 3 : index
    %c0_108 = arith.constant 0 : index
    %c0_109 = arith.constant 0 : index
    %196 = vector.load %arg5[%c0_106, %c3_107, %c0_108, %c0_109] : memref<1x4x128x32xbf16, #tpu.memory_space<vmem>>, vector<1x1x128x32xbf16>
    %197 = vector.shape_cast %196 : vector<1x1x128x32xbf16> to vector<128x32xbf16>
    %c0_110 = arith.constant 0 : index
    %c3_111 = arith.constant 3 : index
    %c0_112 = arith.constant 0 : index
    %c0_113 = arith.constant 0 : index
    %198 = vector.load %arg6[%c0_110, %c3_111, %c0_112, %c0_113] : memref<1x4x128x32xbf16, #tpu.memory_space<vmem>>, vector<1x1x128x32xbf16>
    %199 = vector.shape_cast %198 : vector<1x1x128x32xbf16> to vector<128x32xbf16>
    %cst_114 = arith.constant dense<0.000000e+00> : vector<32x128xf32>
    %200 = tpu.matmul %195, %197, %cst_114 {dimension_numbers = #tpu.dot_dimension_numbers<[1], [1], [0], [0], [0, 0, 1, 0], [], []>} : vector<32x32xbf16>, vector<128x32xbf16>, vector<32x128xf32> -> vector<32x128xf32>
    %201 = arith.truncf %200 : vector<32x128xf32> to vector<32x128xbf16>
    %202 = arith.addf %201, %193 : vector<32x128xbf16>
    %cst_115 = arith.constant dense<0xFF80> : vector<32xbf16>
    %203 = vector.multi_reduction <maximumf>, %202, %cst_115 [1] : vector<32x128xbf16> to vector<32xbf16>
    %204 = vector.shape_cast %203 : vector<32xbf16> to vector<32x1xbf16>
    %205 = vector.broadcast %204 : vector<32x1xbf16> to vector<32x128xbf16>
    %206 = arith.subf %202, %205 : vector<32x128xbf16>
    %207 = math.exp %206 : vector<32x128xbf16>
    %208 = arith.extf %207 : vector<32x128xbf16> to vector<32x128xf32>
    %cst_116 = arith.constant dense<0.000000e+00> : vector<32xf32>
    %209 = vector.multi_reduction <add>, %208, %cst_116 [1] : vector<32x128xf32> to vector<32xf32>
    %210 = vector.shape_cast %209 : vector<32xf32> to vector<32x1xf32>
    %211 = tpu.reciprocal %210 {approx = true} : vector<32x1xf32> -> vector<32x1xf32>
    %212 = arith.truncf %211 : vector<32x1xf32> to vector<32x1xbf16>
    %213 = vector.broadcast %212 : vector<32x1xbf16> to vector<32x128xbf16>
    %214 = arith.mulf %207, %213 : vector<32x128xbf16>
    %c0_117 = arith.constant 0 : index
    %c3_118 = arith.constant 3 : index
    %c0_119 = arith.constant 0 : index
    %c0_120 = arith.constant 0 : index
    %215 = vector.load %arg9[%c0_117, %c3_118, %c0_119, %c0_120] : memref<1x4x32x128xbf16, #tpu.memory_space<vmem>>, vector<1x1x32x128xbf16>
    %216 = vector.shape_cast %215 : vector<1x1x32x128xbf16> to vector<32x128xbf16>
    %217 = arith.extf %216 : vector<32x128xbf16> to vector<32x128xf32>
    %c0_121 = arith.constant 0 : index
    %c3_122 = arith.constant 3 : index
    %c0_123 = arith.constant 0 : index
    %c0_124 = arith.constant 0 : index
    %218 = vector.load %arg8[%c0_121, %c3_122, %c0_123, %c0_124] : memref<1x4x32x128xbf16, #tpu.memory_space<vmem>>, vector<1x1x32x128xbf16>
    %219 = vector.shape_cast %218 : vector<1x1x32x128xbf16> to vector<32x128xbf16>
    %220 = arith.extf %219 : vector<32x128xbf16> to vector<32x128xf32>
    %c0_125 = arith.constant 0 : index
    %221 = memref.load %arg2[%c0_125] : memref<3xf32, #tpu.memory_space<smem>>
    %222 = arith.extf %214 : vector<32x128xbf16> to vector<32x128xf32>
    %223 = vector.broadcast %221 : f32 to vector<32x128xf32>
    %224 = arith.mulf %223, %222 : vector<32x128xf32>
    %c1_126 = arith.constant 1 : index
    %225 = memref.load %arg2[%c1_126] : memref<3xf32, #tpu.memory_space<smem>>
    %226 = vector.broadcast %225 : f32 to vector<32x128xf32>
    %227 = arith.mulf %226, %217 : vector<32x128xf32>
    %228 = arith.addf %224, %227 : vector<32x128xf32>
    %c2_127 = arith.constant 2 : index
    %229 = memref.load %arg2[%c2_127] : memref<3xf32, #tpu.memory_space<smem>>
    %230 = vector.broadcast %229 : f32 to vector<32x128xf32>
    %231 = arith.mulf %230, %220 : vector<32x128xf32>
    %232 = arith.addf %228, %231 : vector<32x128xf32>
    %c0_128 = arith.constant 0 : index
    %233 = memref.load %arg3[%c0_128] : memref<1xf32, #tpu.memory_space<smem>>
    %234 = vector.broadcast %233 : f32 to vector<32x128xf32>
    %235 = arith.addf %232, %234 : vector<32x128xf32>
    %236 = arith.truncf %235 : vector<32x128xf32> to vector<32x128xbf16>
    %237 = arith.addf %236, %193 : vector<32x128xbf16>
    %cst_129 = arith.constant dense<0xFF80> : vector<32xbf16>
    %238 = vector.multi_reduction <maximumf>, %237, %cst_129 [1] : vector<32x128xbf16> to vector<32xbf16>
    %239 = vector.shape_cast %238 : vector<32xbf16> to vector<32x1xbf16>
    %240 = vector.broadcast %239 : vector<32x1xbf16> to vector<32x128xbf16>
    %241 = arith.subf %237, %240 : vector<32x128xbf16>
    %242 = math.exp %241 : vector<32x128xbf16>
    %243 = arith.extf %242 : vector<32x128xbf16> to vector<32x128xf32>
    %cst_130 = arith.constant dense<0.000000e+00> : vector<32xf32>
    %244 = vector.multi_reduction <add>, %243, %cst_130 [1] : vector<32x128xf32> to vector<32xf32>
    %245 = vector.shape_cast %244 : vector<32xf32> to vector<32x1xf32>
    %246 = tpu.reciprocal %245 {approx = true} : vector<32x1xf32> -> vector<32x1xf32>
    %247 = arith.truncf %246 : vector<32x1xf32> to vector<32x1xbf16>
    %248 = vector.broadcast %247 : vector<32x1xbf16> to vector<32x128xbf16>
    %249 = arith.mulf %242, %248 : vector<32x128xbf16>
    %c0_131 = arith.constant 0 : index
    %c3_132 = arith.constant 3 : index
    %c0_133 = arith.constant 0 : index
    %c0_134 = arith.constant 0 : index
    %250 = vector.load %arg11[%c0_131, %c3_132, %c0_133, %c0_134] : memref<1x4x32x128xbf16, #tpu.memory_space<vmem>>, vector<1x1x32x128xbf16>
    %251 = vector.shape_cast %250 : vector<1x1x32x128xbf16> to vector<32x128xbf16>
    %252 = vector.shape_cast %249 : vector<32x128xbf16> to vector<1x1x32x128xbf16>
    tpu.vector_store %arg11[%c0_131, %c3_132, %c0_133, %c0_134], %252 {strides = array<i32>} : memref<1x4x32x128xbf16, #tpu.memory_space<vmem>>, vector<1x1x32x128xbf16>,
    %cst_135 = arith.constant dense<0.000000e+00> : vector<32x32xf32>
    %253 = tpu.matmul %249, %199, %cst_135 {dimension_numbers = #tpu.dot_dimension_numbers<[1], [0], [0], [1], [0, 0, 1, 1], [], []>} : vector<32x128xbf16>, vector<128x32xbf16>, vector<32x32xf32> -> vector<32x32xf32>
    %254 = tpu.concatenate %67, %129, %191, %253 in 1 : vector<32x32xf32>, vector<32x32xf32>, vector<32x32xf32>, vector<32x32xf32> -> vector<32x128xf32>
    %c0_136 = arith.constant 0 : index
    %c0_137 = arith.constant 0 : index
    %c0_138 = arith.constant 0 : index
    %255 = vector.load %arg10[%c0_136, %c0_137, %c0_138] : memref<1x32x128xf32, #tpu.memory_space<vmem>>, vector<1x32x128xf32>
    %256 = vector.shape_cast %255 : vector<1x32x128xf32> to vector<32x128xf32>
    %257 = vector.shape_cast %254 : vector<32x128xf32> to vector<1x32x128xf32>
    tpu.vector_store %arg10[%c0_136, %c0_137, %c0_138], %257 {strides = array<i32>} : memref<1x32x128xf32, #tpu.memory_space<vmem>>, vector<1x32x128xf32>,
    return
  }
  func.func @transform_0(%arg0: i32, %arg1: i32) -> i32 {
    %c0_i32 = arith.constant 0 : i32
    %c0_i32_0 = arith.constant 0 : i32
    return %c0_i32 : i32
  }
  func.func @transform_1(%arg0: i32, %arg1: i32) -> i32 {
    %c0_i32 = arith.constant 0 : i32
    %c0_i32_0 = arith.constant 0 : i32
    return %c0_i32 : i32
  }
  func.func @transform_2(%arg0: i32, %arg1: i32) -> (i32, i32, i32, i32) {
    %c0_i32 = arith.constant 0 : i32
    %c0_i32_0 = arith.constant 0 : i32
    %c0_i32_1 = arith.constant 0 : i32
    return %arg0, %c0_i32, %arg1, %c0_i32_0 : i32, i32, i32, i32
  }
  func.func @transform_3(%arg0: i32, %arg1: i32) -> (i32, i32, i32, i32) {
    %c0_i32 = arith.constant 0 : i32
    %c0_i32_0 = arith.constant 0 : i32
    %c0_i32_1 = arith.constant 0 : i32
    %c0_i32_2 = arith.constant 0 : i32
    return %arg0, %c0_i32, %c0_i32_0, %c0_i32_1 : i32, i32, i32, i32
  }
  func.func @transform_4(%arg0: i32, %arg1: i32) -> (i32, i32, i32, i32) {
    %c0_i32 = arith.constant 0 : i32
    %c0_i32_0 = arith.constant 0 : i32
    %c0_i32_1 = arith.constant 0 : i32
    %c0_i32_2 = arith.constant 0 : i32
    return %arg0, %c0_i32, %c0_i32_0, %c0_i32_1 : i32, i32, i32, i32
  }
  func.func @transform_5(%arg0: i32, %arg1: i32) -> (i32, i32, i32, i32) {
    %c0_i32 = arith.constant 0 : i32
    %c0_i32_0 = arith.constant 0 : i32
    %c0_i32_1 = arith.constant 0 : i32
    return %arg0, %c0_i32, %arg1, %c0_i32_0 : i32, i32, i32, i32
  }
  func.func @transform_6(%arg0: i32, %arg1: i32) -> (i32, i32, i32, i32) {
    %c0_i32 = arith.constant 0 : i32
    %c0_i32_0 = arith.constant 0 : i32
    %c0_i32_1 = arith.constant 0 : i32
    return %arg0, %c0_i32, %arg1, %c0_i32_0 : i32, i32, i32, i32
  }
  func.func @transform_7(%arg0: i32, %arg1: i32) -> (i32, i32, i32, i32) {
    %c0_i32 = arith.constant 0 : i32
    %c0_i32_0 = arith.constant 0 : i32
    %c0_i32_1 = arith.constant 0 : i32
    return %arg0, %c0_i32, %arg1, %c0_i32_0 : i32, i32, i32, i32
  }
  func.func @transform_8(%arg0: i32, %arg1: i32) -> (i32, i32, i32) {
    %c0_i32 = arith.constant 0 : i32
    %c0_i32_0 = arith.constant 0 : i32
    return %arg0, %arg1, %c0_i32 : i32, i32, i32
  }
  func.func @transform_9(%arg0: i32, %arg1: i32) -> (i32, i32, i32, i32) {
    %c0_i32 = arith.constant 0 : i32
    %c0_i32_0 = arith.constant 0 : i32
    %c0_i32_1 = arith.constant 0 : i32
    return %arg0, %c0_i32, %arg1, %c0_i32_0 : i32, i32, i32, i32
  }
}

</mosaic_0001>

<bundles_post_ra>
// kernel: tpu_custom_call.1
= control target key start
LH: loop header
LB: loop body
LE: loop exit
PB: predicated region body
PF: predicated region fallthrough
CT: control target
= control target key end

     0   :  { %s4150_s0 = inlined_call_operand.vmem [shape: f32[3], index: 0, kind: input, shape index: {}]   ;;  %s4151_s1 = inlined_call_operand.<no memory space> [shape: f32[1], index: 1, kind: input, shape index: {}]   ;;  %s4152_s2 = inlined_call_operand.vmem [shape: bf16[2,4,32,32], index: 2, kind: input, shape index: {}]   ;;  %s4153_s3 = inlined_call_operand.vmem [shape: bf16[2,4,128,32], index: 3, kind: input, shape index: {}]   ;;  %s4154_s4 = inlined_call_operand.vmem [shape: bf16[2,4,128,32], index: 4, kind: input, shape index: {}]   ;;  %s4155_s5 = inlined_call_operand.vmem [shape: s8[2,4,32,128], index: 5, kind: input, shape index: {}]   ;;  %s4156_s6 = inlined_call_operand.vmem [shape: bf16[2,4,32,128], index: 6, kind: input, shape index: {}]   ;;  %s4157_s7 = inlined_call_operand.vmem [shape: bf16[2,4,32,128], index: 7, kind: input, shape index: {}]   ;;  %s4158_s8 = inlined_call_operand.hbm [shape: f32[2,32,128], index: 8, kind: output, shape index: {0}]   ;;  %s4159_s9 = inlined_call_operand.hbm [shape: bf16[2,4,32,128], index: 9, kind: output, shape index: {1}]  }
   0x1   :  { %4161 = sst [smem:[#allocation12_spill]] %s4150_s0 }
   0x2   :  { %4162 = sst [smem:[#allocation13_spill]] %s4152_s2 }
   0x3   :  { %15 = sst [smem:[#allocation2]] %s4151_s1 }
   0x4   :  { %16 = vsyncpa [#allocation5], 0 }
   0x5   :  { %17 = vsyncpa [#allocation4], 0 }
   0x6   :  { %19 = vsyncpa [#allocation4 + $0x1], 0 }
   0x7   :  { %20 = vsyncpa [#allocation8], 0 }
   0x8   :  { %22 = vsyncpa [#allocation8 + $0x1], 0  ;;  %s3612_s11 = smov 0   ;;  %s3614_s12 = smov 0  }
   0x9   :  { %s3616_s13 = smov 0   ;;  %s3618_s14 = smov 0  }
   0xa   :  { %s3620_s15 = smov 0   ;;  %s3622_s16 = smov 0  }
   0xb LB: > { %s2539_s1 = sadd.s32 4294967295, %s3548_s16   ;;  %s2540_s17 = sadd.s32 4294967294, %s3548_s16   ;;  %s3548_s16 = sphi %s3622_s16, %s28_s16   ;;  %s3544_s15 = sphi %s3620_s15, %s4174_s15   ;;  %s3540_s14 = sphi %s3618_s14, %s4173_s14   ;;  %s3536_s13 = sphi %s3616_s13, %s4172_s13   ;;  %s3532_s12 = sphi %s3614_s12, %s4171_s12   ;;  %s3528_s11 = sphi %s3612_s11, %s4170_s11  }
   0xc   : > { %s40_s18 = sadd.s32 1, %s3544_s15  ;;  %s255_s19 = sadd.s32 1, %s3536_s13 }
   0xd   : > { %p42_p0 = scmp.ge.s32.totalorder %s40_s18, 2  ;;  %p265_p1 = scmp.ne.s32.totalorder %s3536_s13, %s3532_s12 }
   0xe   : > { %p266_p2 = scmp.eq.s32.totalorder %s2539_s1, 1  ;;  %p271_p3 = scmp.ne.s32.totalorder %s3532_s12, %s3528_s11 }
   0xf   : > { %s4176_s18 = smov (%p42_p0, %s40_s18), 0  ;;  %p272_p5 = scmp.eq.s32.totalorder %s2540_s17, 1 }
  0x10   : > { %p3652_p4 = por %p266_p2, %p265_p1  ;;  %s250_s21 = ssub.s32 %s3544_s15, %s4176_s18 }
  0x11   : > { %p2541_p6 = scmp.ge.s32.totalorder %s3548_s16, 1  ;;  %p253_p7 = scmp.eq.s32.totalorder %s250_s21, 0 }
  0x12   : > { %p3659_p8 = por %p272_p5, %p271_p3  ;;  %p307_p9 = scmp.lt.s32.totalorder %s3548_s16, 3 }
  0x13   : > { %s3665_s23 = scalar_select %p253_p7, %s3536_s13, %s255_s19  }
  0x14   : > { %p3667_p10 = pnand %p2541_p6, %p307_p9  ;;  %p3671_p11 = scmp.eq.s32.totalorder %s2539_s1, 0 }
  0x15   : > { %s4167_s0 = sld [smem:[#allocation12_spill]] }
  0x16   : > { %p3182_p12 = pneg %p3667_p10 }
  0x18   : > { %p3183_p13 = pnand %p3671_p11, %p3182_p12 }
  0x1a   : > { %p3421_p1 = pneg %p3183_p13 }
  0x1b   : > { %s320_s28 = sshll.u32 %s4167_s0, 4  ;;  %s321_s28 = int_to_ptr.vmem [resolvable:$true] %s320_s28 }
  0x1c   : > { %s3419_s29 = scalar_lea.vmem %s321_s28, 16  ;;  %p3427_p5 = scmp.lt.s32.totalorder %s321_s28, %s321_s28 }
  0x1d   : > { %p3420_p0 = scmp.ne.s32.totalorder %s321_s28, %s3419_s29  ;;  %p3428_p6 = scmp.lt.s32.totalorder %s3419_s29, %s3419_s29 }
  0x1f   : > { %p3422_p2 = pnand %p3421_p1, %p3420_p0  ;;  %p3429_p7 = por %p3428_p6, %p3427_p5 }
  0x21   : > { %p3423_p3 = pneg %p3422_p2 }
  0x23   : > { %p3430_p9 = pnand %p3429_p7, %p3423_p3 }
  0x25   : > { %3433 = shalt.err (!%p3430_p9)
}
  0x26   : > { %s3550_s30 = smov [#allocation3]   ;;  %402 = sbr.rel (%p3667_p10) target bundleno = 4204 (0x106c), region = 52 }
  0x27   : > { %3185 = dma.vmem_to_smem (!%p3183_p13), %s321_s28, 16, %s3550_s30, [#allocation5]  }
  0x2d   : > { %3515 = dma.done.wait (%p3671_p11), [#allocation5], 16  }
  0x2e   : > { %3517 = vsyncadd (%p3671_p11), [#allocation5], 4294967280 }
  0x2f   : > { %408 = sfence }
  0x30   : > { %p485_p12 = scmp.lt.s32.totalorder %s3540_s14, 1  ;;  %vm681_vm0 = vcmask 261120   ;;  %s4168_s2 = sld [smem:[#allocation13_spill]] }
  0x31   : > { %s2572_s19 = sld [smem:[#allocation3 + $0x1]]  ;;  %s813_s29 = sld [smem:[#allocation3]] }
  0x32   : > { %s3690_s10 = scalar_select %p485_p12, %s3540_s14, 1 }
  0x33   : > { %s2573_s30 = sld [smem:[#allocation3 + $0x2]]  ;;  %s843_s25 = sld [smem:[#allocation2]] }
  0x34   : > { %s4160_s1 = sshll.u32 %s3690_s10, 8  ;;  %s3705_s24 = sshll.u32 %s3690_s10, 6 }
  0x35   : > { %s3698_s21 = scalar_lea.vmem %s4153_s3, %s4160_s1  ;;  %s2819_s28 = sshll.u32 %s3690_s10, 5 }
  0x36   : > { %v3251_v0 = vld [vmem:[%s3698_s21] sm:$0xff]   ;;  %v3252_v1 = vld [vmem:[%s3698_s21 + $0x8] sm:$0xff]   ;;  %v3253_v3 = vld [vmem:[%s3698_s21 + $0x10] sm:$0xff]   ;;  %s3714_s27 = scalar_lea.vmem %s4168_s2, %s3705_s24  ;;  %s3741_s17 = scalar_lea.vmem %s4155_s5, %s2819_s28 }
  0x37   : > { %3142 = vmatprep.subr.msk.bf16.mxu0 %vm681_vm0, %v3251_v0  ;;  %v689_v2 = vsel %vm681_vm0, %v3251_v0, 0  ;;  %v3254_v4 = vld [vmem:[%s3698_s21 + $0x18] sm:$0xff]   ;;  %v692_v5 = vsel %vm681_vm0, %v3252_v1, 0  ;;  %v3259_v6 = vld [vmem:[%s3714_s27] sm:$0xff]   ;;  %v695_v7 = vsel %vm681_vm0, %v3253_v3, 0  ;;  %v3256_v11 = vld [vmem:[%s3698_s21 + $0x28] sm:$0xff]   ;;  %s3754_s28 = scalar_lea.vmem %s4157_s7, %s3705_s24  ;;  %s3760_s2 = scalar_lea.vmem %s4156_s6, %s3705_s24  ;;  %v3764_v0 = vstv %s2572_s19 }
  0x38   : > { %2983 = vmatpush3.bf16.xpose.msra.mxu0 %v689_v2  ;;  %v698_v8 = vsel %vm681_vm0, %v3254_v4, 0  ;;  %2998 = vmatprep.mubr.msk.bf16.mxu0 %vm681_vm0, %v3259_v6  ;;  %v3255_v9 = vld [vmem:[%s3698_s21 + $0x20] sm:$0xff]   ;;  %v704_v12 = vsel %vm681_vm0, %v3256_v11, 0  ;;  %v3257_v13 = vld [vmem:[%s3698_s21 + $0x30] sm:$0xff]   ;;  %v3258_v15 = vld [vmem:[%s3698_s21 + $0x38] sm:$0xff]   ;;  %v3767_v6 = vstv %s813_s29  ;;  %s4169_s0 = sshll.u32 %s3690_s10, 8 }
  0x39   : > { %3143 = vmatprep.subr.msk.bf16.mxu0 %vm681_vm0, %v3252_v1  ;;  %v701_v10 = vsel %vm681_vm0, %v3255_v9, 0  ;;  %v707_v14 = vsel %vm681_vm0, %v3257_v13, 0  ;;  %v710_v16 = vsel %vm681_vm0, %v3258_v15, 0  ;;  %v3260_v17 = vld [vmem:[%s3714_s27 + $0x8] sm:$0xff]   ;;  %v535_v18 = vld [vmem:[%s3741_s17] sm:$0xff]  ;;  %s3797_s19 = scalar_lea.vmem %s4154_s4, %s4169_s0  ;;  %s3810_s10 = sand.u32 1, %s3532_s12  }
  0x3a   : > { %v539_v19 = vunpack.c.0.s8 %v535_v18  ;;  %v540_v20 = vunpack.c.1.s8 %v535_v18  ;;  %v541_v25 = vunpack.c.2.s8 %v535_v18  ;;  %v542_v26 = vunpack.c.3.s8 %v535_v18  ;;  %v2825_v57 = vld [vmem:[%s3754_s28] sm:$0xff]   ;;  %v2888_v1 = vld [vmem:[%s3754_s28 + $0x8] sm:$0xff]   ;;  %s2547_s26 = sshll.u32 %s3810_s10, 6 }
  0x3b   : > { %v2826_v60 = vunpack.c.l.bf16 %v2825_v57  ;;  %v2833_v61 = vld [vmem:[%s3760_s2] sm:$0xff]   ;;  %v2827_v63 = vunpack.c.h.bf16 %v2825_v57  ;;  %s3813_s29 = scalar_lea.vmem [#allocation7], %s2547_s26  ;;  %s2302_s26 = scalar_lea.sflag [#allocation8], %s3810_s10 }
  0x3c   : > { %v555_v21 = vcvt.s32.f32 %v539_v19  ;;  %v556_v22 = vcvt.s32.f32 %v540_v20  ;;  %v557_v31 = vcvt.s32.f32 %v541_v25  ;;  %v558_v32 = vcvt.s32.f32 %v542_v26 }
  0x3e   : > { %v571_v23 = vmul.f32 -1e+09, %v555_v21  ;;  %v572_v24 = vmul.f32 -1e+09, %v556_v22  ;;  %v573_v37 = vmul.f32 -1e+09, %v557_v31 }
  0x3f   : > { %v574_v38 = vmul.f32 -1e+09, %v558_v32 }
  0x40   : > { %2985 = vmatpush3.bf16.xpose.msra.mxu0 %v692_v5  ;;  %v3744_v30 = vpack.c.bf16 %v572_v24, %v571_v23 }
  0x41   : > { %3144 = vmatprep.subr.msk.bf16.mxu0 %vm681_vm0, %v3253_v3  ;;  %v3747_v39 = vpack.c.bf16 %v574_v38, %v573_v37  ;;  %v2834_v3 = vunpack.c.l.bf16 %v2833_v61 }
  0x48   : > { %2987 = vmatpush3.bf16.xpose.msra.mxu0 %v695_v7  ;;  %v825_v7 = vmul.f32 %v2826_v60, %v3764_v0 }
  0x49   : > { %3145 = vmatprep.subr.msk.bf16.mxu0 %vm681_vm0, %v3254_v4  ;;  %v2835_v4 = vunpack.c.h.bf16 %v2833_v61 }
  0x50   : > { %2989 = vmatpush3.bf16.xpose.msra.mxu0 %v698_v8  ;;  %v3770_v8 = vstv %s2573_s30  ;;  %s2072_s30 = sld [smem:[#allocation2]] }
  0x51   : > { %3146 = vmatprep.subr.msk.bf16.mxu0 %vm681_vm0, %v3255_v9  ;;  %v835_v19 = vmul.f32 %v2834_v3, %v3770_v8  ;;  %v836_v20 = vmul.f32 %v2835_v4, %v3770_v8  ;;  %v3266_v3 = vld [vmem:[%s3797_s19 + $0x28] sm:$0xff]   ;;  %v3267_v4 = vld [vmem:[%s3797_s19 + $0x30] sm:$0xff]  }
  0x58   : > { %2991 = vmatpush3.bf16.xpose.msra.mxu0 %v701_v10 }
  0x59   : > { %3147 = vmatprep.subr.msk.bf16.mxu0 %vm681_vm0, %v3256_v11 }
  0x60   : > { %2993 = vmatpush3.bf16.xpose.msra.mxu0 %v704_v12  ;;  %v826_v12 = vmul.f32 %v2827_v63, %v3764_v0 }
  0x61   : > { %3148 = vmatprep.subr.msk.bf16.mxu0 %vm681_vm0, %v3257_v13  ;;  %v2830_v13 = vunpack.c.l.bf16 %v2888_v1 }
  0x63   : > { %v827_v26 = vmul.f32 %v2830_v13, %v3764_v0 }
  0x68   : > { %2995 = vmatpush3.bf16.xpose.msra.mxu0 %v707_v14  ;;  %v2889_v14 = vld [vmem:[%s3760_s2 + $0x8] sm:$0xff]  }
  0x69   : > { %3149 = vmatprep.subr.msk.bf16.mxu0 %vm681_vm0, %v3258_v15  ;;  %v2838_v22 = vunpack.c.l.bf16 %v2889_v14  ;;  %v2839_v23 = vunpack.c.h.bf16 %v2889_v14 }
  0x6b   : > { %v838_v37 = vmul.f32 %v2839_v23, %v3770_v8 }
  0x70   : > { %2997 = vmatpush3.bf16.xpose.msra.mxu0 %v710_v16  ;;  %v2831_v16 = vunpack.c.h.bf16 %v2888_v1 }
  0x72   : > { %v828_v31 = vmul.f32 %v2831_v16, %v3764_v0 }
  0x77   : > { %2999 = vmatmul.mubr.msk.bf16.vlgmr.msra.gmra.mrb[0].mxu0 %vm681_vm0, %v3260_v17 }
 0x14a   : > { %v3000_v27 = vpop.f32.mrb[0].mxu0 }
 0x14b   : > { %v746_v28 = vpop.f32.mrb[1].mxu0 }
 0x14c   : > { %v3001_v29 = vpop.f32.mrb[2].mxu0 }
 0x14d   : > { %v762_v33 = vpack.c.bf16 %v3001_v29, %v3000_v27  ;;  %v749_v34 = vpop.f32.mrb[3].mxu0  ;;  %v3779_v27 = vstv %s843_s25  ;;  %s2823_s25 = sshll.u32 %s3540_s14, 10 }
 0x14e   : > { %v761_v35 = vpack.c.bf16 %v749_v34, %v746_v28  ;;  %s4048_s24 = scalar_lea.hbm %s4159_s9, %s2823_s25 }
 0x14f   : > { %v764_v40 = vadd.bf16 %v762_v33, %v3747_v39 }
 0x150   : > { %v763_v36 = vadd.bf16 %v761_v35, %v3744_v30 }
 0x152   : > { %765 = vmax.xlane.bf16.xlu0 %v763_v36 }
 0x15a   : > { %767 = vmax.xlane.bf16.xlu0 %v764_v40 }
 0x1e3   : > { %v766_v41 = vpop.xlane.xlu0 %765 }
 0x1e4   : > { %v769_v42 = vsub.bf16 %v763_v36, %v766_v41  ;;  %v837_v36 = vmul.f32 %v2838_v22, %v3770_v8  ;;  %v3277_v22 = vld [vmem:[%s3714_s27 + $0x10] sm:$0xff]  }
 0x1e6   : > { %v772_v43 = vmul.bf16 1069105081, %v769_v42 }
 0x1e8   : > { %3323 = vpow.bf16 %v772_v43 }
 0x1eb   : > { %v768_v44 = vpop.xlane.xlu0 %767 }
 0x1ec   : > { %v770_v45 = vsub.bf16 %v764_v40, %v768_v44 }
 0x1ee   : > { %v775_v46 = vmul.bf16 1069105081, %v770_v45 }
 0x1f0   : > { %3325 = vpow.bf16 %v775_v46 }
 0x1f3   : > { %v3324_v47 = vpop.eup %3323 }
 0x1f4   : > { %v777_v48 = vunpack.c.l.bf16 %v3324_v47  ;;  %v778_v49 = vunpack.c.h.bf16 %v3324_v47 }
 0x1f6   : > { %781 = vadd.xlane.f32.xlu1 %v777_v48 }
 0x1fa   : > { %783 = vadd.xlane.f32.xlu1 %v778_v49 }
 0x1fb   : > { %v3326_v50 = vpop.eup %3325 }
 0x1fc   : > { %v780_v51 = vunpack.c.h.bf16 %v3326_v50  ;;  %v779_v52 = vunpack.c.l.bf16 %v3326_v50 }
 0x1fe   : > { %787 = vadd.xlane.f32.xlu0 %v780_v51  ;;  %785 = vadd.xlane.f32.xlu1 %v779_v52  ;;  %v3262_v51 = vld [vmem:[%s3797_s19 + $0x8] sm:$0xff]   ;;  %v3263_v52 = vld [vmem:[%s3797_s19 + $0x10] sm:$0xff]  }
 0x283   : > { %v782_v53 = vpop.xlane.xlu1 %781 }
 0x284   : > { %3327 = vrcp.f32 %v782_v53  ;;  %v3264_v53 = vld [vmem:[%s3797_s19 + $0x18] sm:$0xff]  }
 0x287   : > { %v784_v54 = vpop.xlane.xlu1 %783 }
 0x288   : > { %3329 = vrcp.f32 %v784_v54 }
 0x28b   : > { %v788_v55 = vpop.xlane.xlu0 %787  ;;  %v786_v56 = vpop.xlane.xlu1 %785 }
 0x28c   : > { %3331 = vrcp.f32 %v788_v55 }
 0x28d   : > { %3333 = vrcp.f32 %v786_v56 }
 0x28e   : > { %v3328_v58 = vpop.eup %3327 }
 0x292   : > { %v3330_v59 = vpop.eup %3329 }
 0x293   : > { %v793_v62 = vpack.c.bf16 %v3330_v59, %v3328_v58 }
 0x295   : > { %v795_v2 = vmul.bf16 %v3324_v47, %v793_v62 }
 0x296   : > { %v3332_v5 = vpop.eup %3331 }
 0x297   : > { %v3334_v9 = vpop.eup %3333  ;;  %v814_v10 = vunpack.c.l.bf16 %v795_v2  ;;  %v815_v11 = vunpack.c.h.bf16 %v795_v2  ;;  %v3265_v2 = vld [vmem:[%s3797_s19 + $0x20] sm:$0xff]  }
 0x298   : > { %v794_v15 = vpack.c.bf16 %v3332_v5, %v3334_v9  ;;  %v3268_v5 = vld [vmem:[%s3797_s19 + $0x38] sm:$0xff]  }
 0x299   : > { %v819_v17 = vmul.f32 %v3767_v6, %v814_v10  ;;  %v820_v18 = vmul.f32 %v3767_v6, %v815_v11 }
 0x29a   : > { %v796_v21 = vmul.bf16 %v3326_v50, %v794_v15 }
 0x29b   : > { %v829_v24 = vadd.f32 %v825_v7, %v819_v17  ;;  %v830_v25 = vadd.f32 %v826_v12, %v820_v18  ;;  %v3269_v7 = vld [vmem:[%s3698_s21 + $0x40] sm:$0xff]  }
 0x29c   : > { %v816_v28 = vunpack.c.l.bf16 %v796_v21  ;;  %v817_v29 = vunpack.c.h.bf16 %v796_v21 }
 0x29d   : > { %v839_v32 = vadd.f32 %v835_v19, %v829_v24  ;;  %v840_v33 = vadd.f32 %v836_v20, %v830_v25  ;;  %v1096_v24 = vsel %vm681_vm0, %v3269_v7, 0  ;;  %v3270_v25 = vld [vmem:[%s3698_s21 + $0x48] sm:$0xff]  }
 0x29e   : > { %v821_v34 = vmul.f32 %v3767_v6, %v816_v28  ;;  %v822_v35 = vmul.f32 %v3767_v6, %v817_v29  ;;  %v1099_v29 = vsel %vm681_vm0, %v3270_v25, 0 }
 0x29f   : > { %v845_v38 = vadd.f32 %v3779_v27, %v839_v32  ;;  %v846_v40 = vadd.f32 %v3779_v27, %v840_v33  ;;  %v3272_v33 = vld [vmem:[%s3698_s21 + $0x58] sm:$0xff]  }
 0x2a0   : > { %v831_v41 = vadd.f32 %v827_v26, %v821_v34  ;;  %v832_v42 = vadd.f32 %v828_v31, %v822_v35  ;;  %v3271_v31 = vld [vmem:[%s3698_s21 + $0x50] sm:$0xff]   ;;  %v1105_v34 = vsel %vm681_vm0, %v3272_v33, 0  ;;  %v3273_v35 = vld [vmem:[%s3698_s21 + $0x60] sm:$0xff]  }
 0x2a1   : > { %v849_v43 = vpack.c.bf16 %v846_v40, %v845_v38  ;;  %v1102_v32 = vsel %vm681_vm0, %v3271_v31, 0  ;;  %v3275_v40 = vld [vmem:[%s3698_s21 + $0x70] sm:$0xff]  }
 0x2a2   : > { %v841_v44 = vadd.f32 %v837_v36, %v831_v41  ;;  %v842_v45 = vadd.f32 %v838_v37, %v832_v42  ;;  %v1108_v36 = vsel %vm681_vm0, %v3273_v35, 0  ;;  %v3274_v37 = vld [vmem:[%s3698_s21 + $0x68] sm:$0xff]   ;;  %v1114_v41 = vsel %vm681_vm0, %v3275_v40, 0  ;;  %v3276_v42 = vld [vmem:[%s3698_s21 + $0x78] sm:$0xff]  }
 0x2a3   : > { %v851_v46 = vadd.bf16 %v849_v43, %v3744_v30  ;;  %v3261_v30 = vld [vmem:[%s3797_s19] sm:$0xff]   ;;  %v1111_v38 = vsel %vm681_vm0, %v3274_v37, 0  ;;  %v1117_v43 = vsel %vm681_vm0, %v3276_v42, 0 }
 0x2a4   : > { %v847_v47 = vadd.f32 %v3779_v27, %v841_v44  ;;  %v848_v48 = vadd.f32 %v3779_v27, %v842_v45  ;;  %3002 = vmatprep.subr.bf16.mxu1 %v3261_v30  ;;  %v3278_v44 = vld [vmem:[%s3714_s27 + $0x18] sm:$0xff]  }
 0x2a5   : > { %853 = vmax.xlane.bf16.xlu1 %v851_v46  ;;  %3003 = vmatpush3.bf16.msra.mxu1 %v3261_v30 }
 0x2a6   : > { %v850_v49 = vpack.c.bf16 %v848_v48, %v847_v47  ;;  %3004 = vmatprep.subr.bf16.mxu1 %v3262_v51 }
 0x2a8   : > { %v852_v50 = vadd.bf16 %v850_v49, %v3747_v39  ;;  %v536_v49 = vld [vmem:[%s3741_s17 + $0x8] sm:$0xff] }
 0x2a9   : > { %3005 = vmatpush3.bf16.msra.mxu1 %v3262_v51  ;;  %v546_v30 = vunpack.c.3.s8 %v536_v49  ;;  %v543_v51 = vunpack.c.0.s8 %v536_v49 }
 0x2aa   : > { %3006 = vmatprep.subr.bf16.mxu1 %v3263_v52 }
 0x2ad   : > { %855 = vmax.xlane.bf16.xlu1 %v852_v50  ;;  %3007 = vmatpush3.bf16.msra.mxu1 %v3263_v52  ;;  %v544_v52 = vunpack.c.1.s8 %v536_v49 }
 0x2ae   : > { %3008 = vmatprep.subr.bf16.mxu1 %v3264_v53 }
 0x2b1   : > { %3009 = vmatpush3.bf16.msra.mxu1 %v3264_v53 }
 0x2b2   : > { %3010 = vmatprep.subr.bf16.mxu1 %v3265_v2 }
 0x2b5   : > { %3011 = vmatpush3.bf16.msra.mxu1 %v3265_v2 }
 0x2b6   : > { %3012 = vmatprep.subr.bf16.mxu1 %v3266_v3 }
 0x2b9   : > { %3013 = vmatpush3.bf16.msra.mxu1 %v3266_v3 }
 0x2ba   : > { %3014 = vmatprep.subr.bf16.mxu1 %v3267_v4 }
 0x2bd   : > { %3015 = vmatpush3.bf16.msra.mxu1 %v3267_v4 }
 0x2be   : > { %3016 = vmatprep.subr.bf16.mxu1 %v3268_v5 }
 0x2c1   : > { %3017 = vmatpush3.bf16.msra.mxu1 %v3268_v5 }
 0x2c2   : > { %3150 = vmatprep.subr.msk.bf16.mxu1 %vm681_vm0, %v3269_v7 }
 0x336   : > { %v854_v39 = vpop.xlane.xlu1 %853 }
 0x337   : > { %v857_v54 = vsub.bf16 %v851_v46, %v854_v39  ;;  %v562_v39 = vcvt.s32.f32 %v546_v30 }
 0x339   : > { %v860_v55 = vmul.bf16 1069105081, %v857_v54  ;;  %v559_v54 = vcvt.s32.f32 %v543_v51 }
 0x33b   : > { %3335 = vpow.bf16 %v860_v55  ;;  %v560_v55 = vcvt.s32.f32 %v544_v52 }
 0x33e   : > { %v856_v56 = vpop.xlane.xlu1 %855 }
 0x33f   : > { %v858_v57 = vsub.bf16 %v852_v50, %v856_v56  ;;  %v545_v50 = vunpack.c.2.s8 %v536_v49 }
 0x341   : > { %v863_v58 = vmul.bf16 1069105081, %v858_v57  ;;  %v561_v53 = vcvt.s32.f32 %v545_v50  ;;  %v578_v57 = vmul.f32 -1e+09, %v562_v39 }
 0x343   : > { %3337 = vpow.bf16 %v863_v58  ;;  %v577_v56 = vmul.f32 -1e+09, %v561_v53  ;;  %v575_v58 = vmul.f32 -1e+09, %v559_v54 }
 0x346   : > { %v3336_v59 = vpop.eup %3335 }
 0x347   : > { %v865_v60 = vunpack.c.l.bf16 %v3336_v59  ;;  %v866_v61 = vunpack.c.h.bf16 %v3336_v59 }
 0x349   : > { %869 = vadd.xlane.f32.xlu0 %v865_v60 }
 0x34d   : > { %871 = vadd.xlane.f32.xlu0 %v866_v61 }
 0x34e   : > { %v3338_v62 = vpop.eup %3337 }
 0x34f   : > { %v868_v63 = vunpack.c.h.bf16 %v3338_v62  ;;  %v867_v1 = vunpack.c.l.bf16 %v3338_v62 }
 0x351   : > { %875 = vadd.xlane.f32.xlu0 %v868_v63  ;;  %873 = vadd.xlane.f32.xlu1 %v867_v1 }
 0x3d6   : > { %v870_v9 = vpop.xlane.xlu0 %869 }
 0x3d7   : > { %3339 = vrcp.f32 %v870_v9 }
 0x3da   : > { %v872_v10 = vpop.xlane.xlu0 %871 }
 0x3db   : > { %3341 = vrcp.f32 %v872_v10 }
 0x3de   : > { %v876_v11 = vpop.xlane.xlu0 %875  ;;  %v874_v12 = vpop.xlane.xlu1 %873 }
 0x3df   : > { %3343 = vrcp.f32 %v876_v11 }
 0x3e0   : > { %3345 = vrcp.f32 %v874_v12 }
 0x3e1   : > { %v3340_v13 = vpop.eup %3339 }
 0x3e5   : > { %v3342_v14 = vpop.eup %3341 }
 0x3e6   : > { %v881_v15 = vpack.c.bf16 %v3342_v14, %v3340_v13 }
 0x3e8   : > { %v883_v16 = vmul.bf16 %v3336_v59, %v881_v15  ;;  %v576_v59 = vmul.f32 -1e+09, %v560_v55 }
 0x3e9   : > { %v3344_v17 = vpop.eup %3343 }
 0x3ea   : > { %v3346_v18 = vpop.eup %3345  ;;  %v2574_v19 = vcombine.low %v883_v16, %v883_v16  ;;  %v2575_v20 = vcombine.high %v883_v16, %v883_v16  ;;  %3018 = vmatprep.mubr.bf16.mxu1 %v883_v16  ;;  %v3856_v1 = vpack.c.bf16 %v576_v59, %v575_v58 }
 0x3eb   : > { %v882_v21 = vpack.c.bf16 %v3344_v17, %v3346_v18 }
 0x3ec   : > { %899 = vst [vmem:[%s3813_s29] sm:$0xf] %v2574_v19  ;;  %900 = vst [vmem:[%s3813_s29 + $0x4] sm:$0xf] %v2575_v20 }
 0x3ed   : > { %v884_v23 = vmul.bf16 %v3338_v62, %v882_v21  ;;  %v3854_v62 = vpack.c.bf16 %v578_v57, %v577_v56 }
 0x3ef   : > { %v2576_v26 = vcombine.low %v884_v23, %v884_v23  ;;  %v2577_v28 = vcombine.high %v884_v23, %v884_v23  ;;  %3019 = vmatmul.mubr.bf16.vlgmr.msra.gmra.mrb[0].mxu1 %v884_v23 }
 0x3f0   : > { %3023 = vmatpush3.bf16.xpose.msra.mxu1 %v1096_v24  ;;  %3038 = vmatprep.mubr.msk.bf16.mxu1 %vm681_vm0, %v3277_v22 }
 0x3f1   : > { %901 = vst [vmem:[%s3813_s29 + $0x8] sm:$0xf] %v2576_v26  ;;  %902 = vst [vmem:[%s3813_s29 + $0xc] sm:$0xf] %v2577_v28  ;;  %3151 = vmatprep.subr.msk.bf16.mxu1 %vm681_vm0, %v3270_v25  ;;  %v2890_v25 = vld [vmem:[%s3754_s28 + $0x10] sm:$0xff]  }
 0x3f2   : > { %v2892_v28 = vld [vmem:[%s3760_s2 + $0x10] sm:$0xff]  }
 0x3f8   : > { %3025 = vmatpush3.bf16.xpose.msra.mxu1 %v1099_v29 }
 0x3f9   : > { %3152 = vmatprep.subr.msk.bf16.mxu1 %vm681_vm0, %v3271_v31  ;;  %v2842_v31 = vunpack.c.l.bf16 %v2890_v25 }
 0x400   : > { %3027 = vmatpush3.bf16.xpose.msra.mxu1 %v1102_v32 }
 0x401   : > { %3153 = vmatprep.subr.msk.bf16.mxu1 %vm681_vm0, %v3272_v33  ;;  %v2843_v33 = vunpack.c.h.bf16 %v2890_v25  ;;  %v3281_v25 = vld [vmem:[%s3797_s19 + $0x50] sm:$0xff]  }
 0x403   : > { %v1235_v51 = vmul.f32 %v2843_v33, %v3764_v0 }
 0x408   : > { %3029 = vmatpush3.bf16.xpose.msra.mxu1 %v1105_v34  ;;  %v2891_v34 = vld [vmem:[%s3754_s28 + $0x18] sm:$0xff]  }
 0x409   : > { %3154 = vmatprep.subr.msk.bf16.mxu1 %vm681_vm0, %v3273_v35  ;;  %v2850_v35 = vunpack.c.l.bf16 %v2892_v28 }
 0x40b   : > { %v1244_v52 = vmul.f32 %v2850_v35, %v3770_v8 }
 0x410   : > { %3031 = vmatpush3.bf16.xpose.msra.mxu1 %v1108_v36 }
 0x411   : > { %3155 = vmatprep.subr.msk.bf16.mxu1 %vm681_vm0, %v3274_v37 }
 0x418   : > { %3033 = vmatpush3.bf16.xpose.msra.mxu1 %v1111_v38  ;;  %v2851_v38 = vunpack.c.h.bf16 %v2892_v28 }
 0x419   : > { %3156 = vmatprep.subr.msk.bf16.mxu1 %vm681_vm0, %v3275_v40  ;;  %v2893_v40 = vld [vmem:[%s3760_s2 + $0x18] sm:$0xff]  }
 0x41a   : > { %v2854_v53 = vunpack.c.l.bf16 %v2893_v40  ;;  %v2855_v39 = vunpack.c.h.bf16 %v2893_v40  ;;  %v1245_v57 = vmul.f32 %v2851_v38, %v3770_v8 }
 0x420   : > { %3035 = vmatpush3.bf16.xpose.msra.mxu1 %v1114_v41 }
 0x421   : > { %3157 = vmatprep.subr.msk.bf16.mxu1 %vm681_vm0, %v3276_v42  ;;  %v1234_v42 = vmul.f32 %v2842_v31, %v3764_v0 }
 0x428   : > { %3037 = vmatpush3.bf16.xpose.msra.mxu1 %v1117_v43  ;;  %v2846_v43 = vunpack.c.l.bf16 %v2891_v34 }
 0x42a   : > { %v1236_v58 = vmul.f32 %v2846_v43, %v3764_v0  ;;  %v3286_v43 = vld [vmem:[%s3797_s19 + $0x78] sm:$0xff]  }
 0x42f   : > { %3039 = vmatmul.mubr.msk.bf16.vlgmr.msra.gmra.mrb[4].mxu1 %vm681_vm0, %v3278_v44  ;;  %v2847_v44 = vunpack.c.h.bf16 %v2891_v34 }
 0x431   : > { %v1237_v59 = vmul.f32 %v2847_v44, %v3764_v0  ;;  %v3287_v44 = vld [vmem:[%s3698_s21 + $0x80] sm:$0xff]  }
 0x4c2   : > { %v3845_v45 = vpop.f32.mrb[0].mxu1 }
 0x4c3   : > { %v3847_v46 = vpop.f32.mrb[1].mxu1 }
 0x4c4   : > { %v3849_v47 = vpop.f32.mrb[2].mxu1 }
 0x4c5   : > { %v3851_v48 = vpop.f32.mrb[3].mxu1 }
 0x502   : > { %v3040_v60 = vpop.f32.mrb[4].mxu1 }
 0x503   : > { %v1153_v61 = vpop.f32.mrb[5].mxu1 }
 0x504   : > { %v3041_v63 = vpop.f32.mrb[6].mxu1 }
 0x505   : > { %v1169_v2 = vpack.c.bf16 %v3041_v63, %v3040_v60  ;;  %v1156_v3 = vpop.f32.mrb[7].mxu1 }
 0x506   : > { %v1168_v4 = vpack.c.bf16 %v1156_v3, %v1153_v61  ;;  %v1246_v3 = vmul.f32 %v2854_v53, %v3770_v8 }
 0x507   : > { %v1171_v5 = vadd.bf16 %v1169_v2, %v3854_v62 }
 0x508   : > { %v1170_v7 = vadd.bf16 %v1168_v4, %v3856_v1  ;;  %v1247_v4 = vmul.f32 %v2855_v39, %v3770_v8 }
 0x509   : > { %1174 = vmax.xlane.bf16.xlu1 %v1171_v5 }
 0x50a   : > { %1172 = vmax.xlane.bf16.xlu0 %v1170_v7 }
 0x59a   : > { %v1175_v9 = vpop.xlane.xlu1 %1174 }
 0x59b   : > { %v1177_v10 = vsub.bf16 %v1171_v5, %v1175_v9  ;;  %v1173_v11 = vpop.xlane.xlu0 %1172 }
 0x59c   : > { %v1176_v12 = vsub.bf16 %v1170_v7, %v1173_v11 }
 0x59d   : > { %v1182_v13 = vmul.bf16 1069105081, %v1177_v10 }
 0x59e   : > { %v1179_v14 = vmul.bf16 1069105081, %v1176_v12 }
 0x5a0   : > { %3347 = vpow.bf16 %v1179_v14 }
 0x5a1   : > { %3349 = vpow.bf16 %v1182_v13 }
 0x5ab   : > { %v3348_v15 = vpop.eup %3347 }
 0x5ac   : > { %v1185_v16 = vunpack.c.h.bf16 %v3348_v15  ;;  %v1184_v17 = vunpack.c.l.bf16 %v3348_v15  ;;  %v3350_v18 = vpop.eup %3349 }
 0x5ad   : > { %v1187_v19 = vunpack.c.h.bf16 %v3350_v18  ;;  %v1186_v20 = vunpack.c.l.bf16 %v3350_v18 }
 0x5ae   : > { %1190 = vadd.xlane.f32.xlu1 %v1185_v16  ;;  %1188 = vadd.xlane.f32.xlu0 %v1184_v17 }
 0x5b2   : > { %1194 = vadd.xlane.f32.xlu1 %v1187_v19  ;;  %1192 = vadd.xlane.f32.xlu0 %v1186_v20 }
 0x63b   : > { %v1191_v21 = vpop.xlane.xlu1 %1190  ;;  %v1189_v22 = vpop.xlane.xlu0 %1188 }
 0x63c   : > { %3351 = vrcp.f32 %v1191_v21 }
 0x63d   : > { %3353 = vrcp.f32 %v1189_v22 }
 0x63f   : > { %v1195_v23 = vpop.xlane.xlu1 %1194  ;;  %v1193_v24 = vpop.xlane.xlu0 %1192 }
 0x640   : > { %3355 = vrcp.f32 %v1195_v23  ;;  %v3279_v23 = vld [vmem:[%s3797_s19 + $0x40] sm:$0xff]  }
 0x641   : > { %3357 = vrcp.f32 %v1193_v24  ;;  %v3280_v24 = vld [vmem:[%s3797_s19 + $0x48] sm:$0xff]   ;;  %3042 = vmatprep.subr.bf16.mxu0 %v3279_v23 }
 0x642   : > { %3043 = vmatpush3.bf16.msra.mxu0 %v3279_v23 }
 0x643   : > { %3044 = vmatprep.subr.bf16.mxu0 %v3280_v24 }
 0x646   : > { %v3352_v26 = vpop.eup %3351  ;;  %3045 = vmatpush3.bf16.msra.mxu0 %v3280_v24 }
 0x647   : > { %v3354_v29 = vpop.eup %3353  ;;  %3046 = vmatprep.subr.bf16.mxu0 %v3281_v25 }
 0x648   : > { %v1200_v32 = vpack.c.bf16 %v3352_v26, %v3354_v29  ;;  %v3282_v26 = vld [vmem:[%s3797_s19 + $0x58] sm:$0xff]  }
 0x64a   : > { %v3356_v36 = vpop.eup %3355  ;;  %v1202_v37 = vmul.bf16 %v3348_v15, %v1200_v32  ;;  %3047 = vmatpush3.bf16.msra.mxu0 %v3281_v25  ;;  %v537_v25 = vld [vmem:[%s3741_s17 + $0x10] sm:$0xff] }
 0x64b   : > { %v3358_v41 = vpop.eup %3357  ;;  %3048 = vmatprep.subr.bf16.mxu0 %v3282_v26 }
 0x64c   : > { %v1201_v49 = vpack.c.bf16 %v3356_v36, %v3358_v41  ;;  %v1223_v50 = vunpack.c.l.bf16 %v1202_v37  ;;  %v1224_v30 = vunpack.c.h.bf16 %v1202_v37  ;;  %v3284_v41 = vld [vmem:[%s3797_s19 + $0x68] sm:$0xff]  }
 0x64e   : > { %v1203_v54 = vmul.bf16 %v3350_v18, %v1201_v49  ;;  %v1228_v55 = vmul.f32 %v1223_v50, %v3767_v6  ;;  %v1229_v56 = vmul.f32 %v1224_v30, %v3767_v6  ;;  %3049 = vmatpush3.bf16.msra.mxu0 %v3282_v26  ;;  %v549_v26 = vunpack.c.2.s8 %v537_v25 }
 0x650   : > { %v1238_v60 = vadd.f32 %v1234_v42, %v1228_v55  ;;  %v1239_v61 = vadd.f32 %v1235_v51, %v1229_v56  ;;  %v1225_v63 = vunpack.c.l.bf16 %v1203_v54  ;;  %v1226_v2 = vunpack.c.h.bf16 %v1203_v54  ;;  %v3285_v42 = vld [vmem:[%s3797_s19 + $0x70] sm:$0xff]  }
 0x652   : > { %v1248_v5 = vadd.f32 %v1244_v52, %v1238_v60  ;;  %v1249_v7 = vadd.f32 %v1245_v57, %v1239_v61  ;;  %v1230_v9 = vmul.f32 %v1225_v63, %v3767_v6  ;;  %v1231_v10 = vmul.f32 %v1226_v2, %v3767_v6  ;;  %v3295_v60 = vld [vmem:[%s3714_s27 + $0x20] sm:$0xff]   ;;  %v3288_v2 = vld [vmem:[%s3698_s21 + $0x88] sm:$0xff]  }
 0x653   : > { %v1506_v63 = vsel %vm681_vm0, %v3287_v44, 0 }
 0x654   : > { %v1254_v11 = vadd.f32 %v1248_v5, %v3779_v27  ;;  %v1255_v12 = vadd.f32 %v1249_v7, %v3779_v27  ;;  %v1240_v13 = vadd.f32 %v1236_v58, %v1230_v9  ;;  %v1241_v14 = vadd.f32 %v1237_v59, %v1231_v10  ;;  %v3289_v7 = vld [vmem:[%s3698_s21 + $0x90] sm:$0xff]   ;;  %v3290_v10 = vld [vmem:[%s3698_s21 + $0x98] sm:$0xff]  }
 0x655   : > { %v1509_v5 = vsel %vm681_vm0, %v3288_v2, 0  ;;  %v1512_v9 = vsel %vm681_vm0, %v3289_v7, 0 }
 0x656   : > { %v1258_v15 = vpack.c.bf16 %v1255_v12, %v1254_v11  ;;  %v1250_v16 = vadd.f32 %v1246_v3, %v1240_v13  ;;  %v1251_v17 = vadd.f32 %v1247_v4, %v1241_v14  ;;  %v1515_v11 = vsel %vm681_vm0, %v3290_v10, 0  ;;  %v3291_v12 = vld [vmem:[%s3698_s21 + $0xa0] sm:$0xff]   ;;  %v3292_v14 = vld [vmem:[%s3698_s21 + $0xa8] sm:$0xff]  }
 0x657   : > { %v1518_v13 = vsel %vm681_vm0, %v3291_v12, 0 }
 0x658   : > { %v1260_v18 = vadd.bf16 %v1258_v15, %v3856_v1  ;;  %v1256_v19 = vadd.f32 %v1250_v16, %v3779_v27  ;;  %v1257_v20 = vadd.f32 %v1251_v17, %v3779_v27  ;;  %v3283_v1 = vld [vmem:[%s3797_s19 + $0x60] sm:$0xff]   ;;  %v1521_v15 = vsel %vm681_vm0, %v3292_v14, 0  ;;  %v3293_v16 = vld [vmem:[%s3698_s21 + $0xb0] sm:$0xff]  }
 0x659   : > { %3050 = vmatprep.subr.bf16.mxu0 %v3283_v1  ;;  %v1524_v17 = vsel %vm681_vm0, %v3293_v16, 0 }
 0x65a   : > { %1262 = vmax.xlane.bf16.xlu0 %v1260_v18  ;;  %v1259_v21 = vpack.c.bf16 %v1257_v20, %v1256_v19  ;;  %3051 = vmatpush3.bf16.msra.mxu0 %v3283_v1  ;;  %v3296_v20 = vld [vmem:[%s3714_s27 + $0x28] sm:$0xff]   ;;  %v550_v1 = vunpack.c.3.s8 %v537_v25 }
 0x65b   : > { %3052 = vmatprep.subr.bf16.mxu0 %v3284_v41 }
 0x65c   : > { %v1261_v22 = vadd.bf16 %v1259_v21, %v3854_v62 }
 0x65e   : > { %1264 = vmax.xlane.bf16.xlu1 %v1261_v22  ;;  %3053 = vmatpush3.bf16.msra.mxu0 %v3284_v41 }
 0x65f   : > { %3054 = vmatprep.subr.bf16.mxu0 %v3285_v42 }
 0x662   : > { %3055 = vmatpush3.bf16.msra.mxu0 %v3285_v42 }
 0x663   : > { %3056 = vmatprep.subr.bf16.mxu0 %v3286_v43 }
 0x666   : > { %3057 = vmatpush3.bf16.msra.mxu0 %v3286_v43 }
 0x667   : > { %3158 = vmatprep.subr.msk.bf16.mxu0 %vm681_vm0, %v3287_v44 }
 0x6eb   : > { %v1263_v28 = vpop.xlane.xlu0 %1262 }
 0x6ec   : > { %v1266_v29 = vsub.bf16 %v1260_v18, %v1263_v28  ;;  %v3294_v18 = vld [vmem:[%s3698_s21 + $0xb8] sm:$0xff]   ;;  %v547_v28 = vunpack.c.0.s8 %v537_v25 }
 0x6ed   : > { %v1527_v19 = vsel %vm681_vm0, %v3294_v18, 0 }
 0x6ee   : > { %v1269_v31 = vmul.bf16 1069105081, %v1266_v29  ;;  %v548_v29 = vunpack.c.1.s8 %v537_v25 }
 0x6ef   : > { %v1265_v62 = vpop.xlane.xlu1 %1264 }
 0x6f0   : > { %3359 = vpow.bf16 %v1269_v31  ;;  %v1267_v32 = vsub.bf16 %v1261_v22, %v1265_v62  ;;  %v565_v31 = vcvt.s32.f32 %v549_v26  ;;  %v566_v62 = vcvt.s32.f32 %v550_v1 }
 0x6f2   : > { %v1272_v33 = vmul.bf16 1069105081, %v1267_v32  ;;  %v563_v32 = vcvt.s32.f32 %v547_v28 }
 0x6f4   : > { %3361 = vpow.bf16 %v1272_v33  ;;  %v564_v33 = vcvt.s32.f32 %v548_v29 }
 0x6fb   : > { %v3360_v34 = vpop.eup %3359 }
 0x6fc   : > { %v1275_v35 = vunpack.c.h.bf16 %v3360_v34  ;;  %v1274_v36 = vunpack.c.l.bf16 %v3360_v34 }
 0x6fe   : > { %1280 = vadd.xlane.f32.xlu1 %v1275_v35  ;;  %1278 = vadd.xlane.f32.xlu0 %v1274_v36  ;;  %v582_v35 = vmul.f32 -1e+09, %v566_v62  ;;  %v579_v36 = vmul.f32 -1e+09, %v563_v32 }
 0x6ff   : > { %v3362_v37 = vpop.eup %3361 }
 0x700   : > { %v1277_v38 = vunpack.c.h.bf16 %v3362_v37  ;;  %v1276_v40 = vunpack.c.l.bf16 %v3362_v37 }
 0x702   : > { %1284 = vadd.xlane.f32.xlu1 %v1277_v38  ;;  %1282 = vadd.xlane.f32.xlu0 %v1276_v40 }
 0x78b   : > { %v1281_v49 = vpop.xlane.xlu1 %1280  ;;  %v1279_v50 = vpop.xlane.xlu0 %1278 }
 0x78c   : > { %3363 = vrcp.f32 %v1281_v49 }
 0x78d   : > { %3365 = vrcp.f32 %v1279_v50 }
 0x78f   : > { %v1285_v30 = vpop.xlane.xlu1 %1284  ;;  %v1283_v51 = vpop.xlane.xlu0 %1282 }
 0x790   : > { %3367 = vrcp.f32 %v1285_v30 }
 0x791   : > { %3369 = vrcp.f32 %v1283_v51 }
 0x796   : > { %v3364_v52 = vpop.eup %3363 }
 0x797   : > { %v3366_v53 = vpop.eup %3365 }
 0x798   : > { %v1290_v39 = vpack.c.bf16 %v3364_v52, %v3366_v53 }
 0x79a   : > { %v3368_v54 = vpop.eup %3367  ;;  %v1292_v55 = vmul.bf16 %v3360_v34, %v1290_v39  ;;  %v581_v34 = vmul.f32 -1e+09, %v565_v31 }
 0x79b   : > { %v3370_v56 = vpop.eup %3369 }
 0x79c   : > { %v2644_v57 = vcombine.low %v1292_v55, %v1292_v55  ;;  %v2645_v58 = vcombine.high %v1292_v55, %v1292_v55  ;;  %3058 = vmatprep.mubr.bf16.mxu0 %v1292_v55  ;;  %v1291_v59 = vpack.c.bf16 %v3368_v54, %v3370_v56  ;;  %v3931_v41 = vpack.c.bf16 %v582_v35, %v581_v34 }
 0x79e   : > { %2648 = vst [vmem:[%s3813_s29 + $0x10] sm:$0xf] %v2644_v57  ;;  %2649 = vst [vmem:[%s3813_s29 + $0x14] sm:$0xf] %v2645_v58  ;;  %v1293_v61 = vmul.bf16 %v3362_v37, %v1291_v59  ;;  %v580_v37 = vmul.f32 -1e+09, %v564_v33 }
 0x7a0   : > { %v2646_v3 = vcombine.low %v1293_v61, %v1293_v61  ;;  %v2647_v4 = vcombine.high %v1293_v61, %v1293_v61  ;;  %3059 = vmatmul.mubr.bf16.vlgmr.msra.gmra.mrb[4].mxu0 %v1293_v61  ;;  %v3933_v43 = vpack.c.bf16 %v580_v37, %v579_v36 }
 0x7a1   : > { %3063 = vmatpush3.bf16.xpose.msra.mxu0 %v1506_v63  ;;  %3078 = vmatprep.mubr.msk.bf16.mxu0 %vm681_vm0, %v3295_v60 }
 0x7a2   : > { %2650 = vst [vmem:[%s3813_s29 + $0x18] sm:$0xf] %v2646_v3  ;;  %2651 = vst [vmem:[%s3813_s29 + $0x1c] sm:$0xf] %v2647_v4  ;;  %3159 = vmatprep.subr.msk.bf16.mxu0 %vm681_vm0, %v3288_v2 }
 0x7a9   : > { %3065 = vmatpush3.bf16.xpose.msra.mxu0 %v1509_v5 }
 0x7aa   : > { %3160 = vmatprep.subr.msk.bf16.mxu0 %vm681_vm0, %v3289_v7  ;;  %v2894_v7 = vld [vmem:[%s3754_s28 + $0x20] sm:$0xff]  }
 0x7b1   : > { %3067 = vmatpush3.bf16.xpose.msra.mxu0 %v1512_v9 }
 0x7b2   : > { %3161 = vmatprep.subr.msk.bf16.mxu0 %vm681_vm0, %v3290_v10  ;;  %v2896_v10 = vld [vmem:[%s3760_s2 + $0x20] sm:$0xff]  }
 0x7b9   : > { %3069 = vmatpush3.bf16.xpose.msra.mxu0 %v1515_v11 }
 0x7ba   : > { %3162 = vmatprep.subr.msk.bf16.mxu0 %vm681_vm0, %v3291_v12  ;;  %v2858_v12 = vunpack.c.l.bf16 %v2894_v7 }
 0x7bc   : > { %v1644_v26 = vmul.f32 %v2858_v12, %v3764_v0 }
 0x7c1   : > { %3071 = vmatpush3.bf16.xpose.msra.mxu0 %v1518_v13 }
 0x7c2   : > { %3163 = vmatprep.subr.msk.bf16.mxu0 %vm681_vm0, %v3292_v14  ;;  %v2859_v14 = vunpack.c.h.bf16 %v2894_v7  ;;  %v3298_v7 = vld [vmem:[%s3797_s19 + $0x88] sm:$0xff]  }
 0x7c4   : > { %v1645_v32 = vmul.f32 %v2859_v14, %v3764_v0 }
 0x7c9   : > { %3073 = vmatpush3.bf16.xpose.msra.mxu0 %v1521_v15  ;;  %v2895_v15 = vld [vmem:[%s3754_s28 + $0x28] sm:$0xff]  }
 0x7ca   : > { %3164 = vmatprep.subr.msk.bf16.mxu0 %vm681_vm0, %v3293_v16  ;;  %v2866_v16 = vunpack.c.l.bf16 %v2896_v10  ;;  %v2862_v1 = vunpack.c.l.bf16 %v2895_v15  ;;  %v2863_v28 = vunpack.c.h.bf16 %v2895_v15 }
 0x7cc   : > { %v1654_v33 = vmul.f32 %v2866_v16, %v3770_v8 }
 0x7d1   : > { %3075 = vmatpush3.bf16.xpose.msra.mxu0 %v1524_v17 }
 0x7d2   : > { %3165 = vmatprep.subr.msk.bf16.mxu0 %vm681_vm0, %v3294_v18 }
 0x7d9   : > { %3077 = vmatpush3.bf16.xpose.msra.mxu0 %v1527_v19  ;;  %v2867_v19 = vunpack.c.h.bf16 %v2896_v10  ;;  %v3300_v10 = vld [vmem:[%s3797_s19 + $0x98] sm:$0xff]  }
 0x7e0   : > { %3079 = vmatmul.mubr.msk.bf16.vlgmr.msra.gmra.mrb[8].mxu0 %vm681_vm0, %v3296_v20  ;;  %v2897_v20 = vld [vmem:[%s3760_s2 + $0x28] sm:$0xff]  }
 0x7e1   : > { %v2870_v34 = vunpack.c.l.bf16 %v2897_v20  ;;  %v2871_v35 = vunpack.c.h.bf16 %v2897_v20 }
 0x873   : > { %v3922_v21 = vpop.f32.mrb[4].mxu0 }
 0x874   : > { %v3924_v22 = vpop.f32.mrb[5].mxu0 }
 0x875   : > { %v3926_v23 = vpop.f32.mrb[6].mxu0 }
 0x876   : > { %v3928_v24 = vpop.f32.mrb[7].mxu0 }
 0x8b3   : > { %v3080_v38 = vpop.f32.mrb[8].mxu0 }
 0x8b4   : > { %v1563_v40 = vpop.f32.mrb[9].mxu0 }
 0x8b5   : > { %v3081_v42 = vpop.f32.mrb[10].mxu0 }
 0x8b6   : > { %v1579_v44 = vpack.c.bf16 %v3081_v42, %v3080_v38  ;;  %v1566_v49 = vpop.f32.mrb[11].mxu0  ;;  %v1646_v42 = vmul.f32 %v2862_v1, %v3764_v0  ;;  %v3304_v1 = vld [vmem:[%s3797_s19 + $0xb8] sm:$0xff]  }
 0x8b7   : > { %v1578_v50 = vpack.c.bf16 %v1566_v49, %v1563_v40  ;;  %v1655_v40 = vmul.f32 %v2867_v19, %v3770_v8 }
 0x8b8   : > { %v1581_v30 = vadd.bf16 %v1579_v44, %v3931_v41  ;;  %v1647_v44 = vmul.f32 %v2863_v28, %v3764_v0  ;;  %v3305_v28 = vld [vmem:[%s3698_s21 + $0xc0] sm:$0xff]  }
 0x8b9   : > { %v1580_v51 = vadd.bf16 %v1578_v50, %v3933_v43 }
 0x8ba   : > { %1584 = vmax.xlane.bf16.xlu1 %v1581_v30 }
 0x8bb   : > { %1582 = vmax.xlane.bf16.xlu0 %v1580_v51 }
 0x94b   : > { %v1585_v52 = vpop.xlane.xlu1 %1584 }
 0x94c   : > { %v1587_v53 = vsub.bf16 %v1581_v30, %v1585_v52  ;;  %v1583_v39 = vpop.xlane.xlu0 %1582  ;;  %v1656_v52 = vmul.f32 %v2870_v34, %v3770_v8 }
 0x94d   : > { %v1586_v54 = vsub.bf16 %v1580_v51, %v1583_v39 }
 0x94e   : > { %v1592_v55 = vmul.bf16 1069105081, %v1587_v53  ;;  %v1657_v53 = vmul.f32 %v2871_v35, %v3770_v8 }
 0x94f   : > { %v1589_v56 = vmul.bf16 1069105081, %v1586_v54 }
 0x951   : > { %3371 = vpow.bf16 %v1589_v56 }
 0x952   : > { %3373 = vpow.bf16 %v1592_v55 }
 0x95c   : > { %v3372_v57 = vpop.eup %3371 }
 0x95d   : > { %v1595_v58 = vunpack.c.h.bf16 %v3372_v57  ;;  %v1594_v59 = vunpack.c.l.bf16 %v3372_v57  ;;  %v3374_v60 = vpop.eup %3373 }
 0x95e   : > { %v1597_v61 = vunpack.c.h.bf16 %v3374_v60  ;;  %v1596_v63 = vunpack.c.l.bf16 %v3374_v60 }
 0x95f   : > { %1600 = vadd.xlane.f32.xlu1 %v1595_v58  ;;  %1598 = vadd.xlane.f32.xlu0 %v1594_v59 }
 0x963   : > { %1604 = vadd.xlane.f32.xlu1 %v1597_v61  ;;  %1602 = vadd.xlane.f32.xlu0 %v1596_v63 }
 0x9ec   : > { %v1601_v2 = vpop.xlane.xlu1 %1600  ;;  %v1599_v3 = vpop.xlane.xlu0 %1598 }
 0x9ed   : > { %3375 = vrcp.f32 %v1601_v2 }
 0x9ee   : > { %3377 = vrcp.f32 %v1599_v3 }
 0x9f0   : > { %v1605_v4 = vpop.xlane.xlu1 %1604  ;;  %v1603_v5 = vpop.xlane.xlu0 %1602 }
 0x9f1   : > { %3379 = vrcp.f32 %v1605_v4 }
 0x9f2   : > { %3381 = vrcp.f32 %v1603_v5  ;;  %v3297_v5 = vld [vmem:[%s3797_s19 + $0x80] sm:$0xff]  }
 0x9f3   : > { %3082 = vmatprep.subr.bf16.mxu1 %v3297_v5 }
 0x9f4   : > { %3083 = vmatpush3.bf16.msra.mxu1 %v3297_v5 }
 0x9f5   : > { %3084 = vmatprep.subr.bf16.mxu1 %v3298_v7 }
 0x9f7   : > { %v3376_v9 = vpop.eup %3375 }
 0x9f8   : > { %v3378_v11 = vpop.eup %3377  ;;  %3085 = vmatpush3.bf16.msra.mxu1 %v3298_v7 }
 0x9f9   : > { %v1610_v13 = vpack.c.bf16 %v3376_v9, %v3378_v11  ;;  %v3299_v9 = vld [vmem:[%s3797_s19 + $0x90] sm:$0xff]  }
 0x9fa   : > { %3086 = vmatprep.subr.bf16.mxu1 %v3299_v9 }
 0x9fb   : > { %v3380_v17 = vpop.eup %3379  ;;  %v1612_v18 = vmul.bf16 %v3372_v57, %v1610_v13 }
 0x9fc   : > { %v3382_v25 = vpop.eup %3381  ;;  %3087 = vmatpush3.bf16.msra.mxu1 %v3299_v9  ;;  %v538_v9 = vld [vmem:[%s3741_s17 + $0x18] sm:$0xff]  ;;  %s2042_s17 = sld [smem:[#allocation3]] }
 0x9fd   : > { %v1611_v29 = vpack.c.bf16 %v3380_v17, %v3382_v25  ;;  %v1633_v31 = vunpack.c.l.bf16 %v1612_v18  ;;  %v1634_v62 = vunpack.c.h.bf16 %v1612_v18  ;;  %3088 = vmatprep.subr.bf16.mxu1 %v3300_v10  ;;  %v3302_v25 = vld [vmem:[%s3797_s19 + $0xa8] sm:$0xff]  }
 0x9ff   : > { %v1613_v36 = vmul.bf16 %v3374_v60, %v1611_v29  ;;  %v1638_v37 = vmul.f32 %v1633_v31, %v3767_v6  ;;  %v1639_v38 = vmul.f32 %v1634_v62, %v3767_v6 }
 0xa00   : > { %3089 = vmatpush3.bf16.msra.mxu1 %v3300_v10  ;;  %v553_v10 = vunpack.c.2.s8 %v538_v9 }
 0xa01   : > { %v1648_v49 = vadd.f32 %v1644_v26, %v1638_v37  ;;  %v1649_v50 = vadd.f32 %v1645_v32, %v1639_v38  ;;  %v1635_v30 = vunpack.c.l.bf16 %v1613_v36  ;;  %v1636_v51 = vunpack.c.h.bf16 %v1613_v36  ;;  %v3303_v26 = vld [vmem:[%s3797_s19 + $0xb0] sm:$0xff]  }
 0xa03   : > { %v1658_v39 = vadd.f32 %v1654_v33, %v1648_v49  ;;  %v1659_v54 = vadd.f32 %v1655_v40, %v1649_v50  ;;  %v1640_v55 = vmul.f32 %v1635_v30, %v3767_v6  ;;  %v1641_v56 = vmul.f32 %v1636_v51, %v3767_v6  ;;  %v3313_v49 = vld [vmem:[%s3714_s27 + $0x30] sm:$0xff]   ;;  %v3306_v51 = vld [vmem:[%s3698_s21 + $0xc8] sm:$0xff]  }
 0xa04   : > { %v1916_v30 = vsel %vm681_vm0, %v3305_v28, 0 }
 0xa05   : > { %v1664_v57 = vadd.f32 %v1658_v39, %v3779_v27  ;;  %v1665_v0 = vadd.f32 %v1659_v54, %v3779_v27  ;;  %v1650_v58 = vadd.f32 %v1646_v42, %v1640_v55  ;;  %v1651_v59 = vadd.f32 %v1647_v44, %v1641_v56  ;;  %v3307_v54 = vld [vmem:[%s3698_s21 + $0xd0] sm:$0xff]   ;;  %v3308_v56 = vld [vmem:[%s3698_s21 + $0xd8] sm:$0xff]  }
 0xa06   : > { %v1919_v39 = vsel %vm681_vm0, %v3306_v51, 0  ;;  %v1922_v55 = vsel %vm681_vm0, %v3307_v54, 0 }
 0xa07   : > { %v1668_v60 = vpack.c.bf16 %v1665_v0, %v1664_v57  ;;  %v1660_v61 = vadd.f32 %v1656_v52, %v1650_v58  ;;  %v1661_v63 = vadd.f32 %v1657_v53, %v1651_v59  ;;  %v1925_v57 = vsel %vm681_vm0, %v3308_v56, 0  ;;  %v3309_v0 = vld [vmem:[%s3698_s21 + $0xe0] sm:$0xff]   ;;  %v3310_v59 = vld [vmem:[%s3698_s21 + $0xe8] sm:$0xff]  }
 0xa08   : > { %v1928_v58 = vsel %vm681_vm0, %v3309_v0, 0 }
 0xa09   : > { %v1670_v8 = vadd.bf16 %v1668_v60, %v3933_v43  ;;  %v1666_v2 = vadd.f32 %v1660_v61, %v3779_v27  ;;  %v1667_v3 = vadd.f32 %v1661_v63, %v3779_v27  ;;  %v3301_v43 = vld [vmem:[%s3797_s19 + $0xa0] sm:$0xff]   ;;  %v1931_v60 = vsel %vm681_vm0, %v3310_v59, 0  ;;  %v3311_v61 = vld [vmem:[%s3698_s21 + $0xf0] sm:$0xff]  }
 0xa0a   : > { %3090 = vmatprep.subr.bf16.mxu1 %v3301_v43  ;;  %v1934_v63 = vsel %vm681_vm0, %v3311_v61, 0 }
 0xa0b   : > { %1672 = vmax.xlane.bf16.xlu0 %v1670_v8  ;;  %v1669_v6 = vpack.c.bf16 %v1667_v3, %v1666_v2  ;;  %3091 = vmatpush3.bf16.msra.mxu1 %v3301_v43  ;;  %v3314_v3 = vld [vmem:[%s3714_s27 + $0x38] sm:$0xff]   ;;  %v554_v43 = vunpack.c.3.s8 %v538_v9  ;;  %s2791_s27 = sld [smem:[#allocation3 + $0x2]] }
 0xa0c   : > { %3092 = vmatprep.subr.bf16.mxu1 %v3302_v25 }
 0xa0d   : > { %v1671_v4 = vadd.bf16 %v1669_v6, %v3931_v41 }
 0xa0f   : > { %1674 = vmax.xlane.bf16.xlu1 %v1671_v4  ;;  %3093 = vmatpush3.bf16.msra.mxu1 %v3302_v25 }
 0xa10   : > { %3094 = vmatprep.subr.bf16.mxu1 %v3303_v26 }
 0xa13   : > { %3095 = vmatpush3.bf16.msra.mxu1 %v3303_v26 }
 0xa14   : > { %3096 = vmatprep.subr.bf16.mxu1 %v3304_v1 }
 0xa17   : > { %3097 = vmatpush3.bf16.msra.mxu1 %v3304_v1 }
 0xa18   : > { %3166 = vmatprep.subr.msk.bf16.mxu1 %vm681_vm0, %v3305_v28 }
 0xa9c   : > { %v1673_v27 = vpop.xlane.xlu0 %1672 }
 0xa9d   : > { %v1676_v11 = vsub.bf16 %v1670_v8, %v1673_v27  ;;  %v3312_v8 = vld [vmem:[%s3698_s21 + $0xf8] sm:$0xff]   ;;  %v551_v27 = vunpack.c.0.s8 %v538_v9  ;;  %s2790_s21 = sld [smem:[#allocation3 + $0x1]] }
 0xa9e   : > { %v1937_v2 = vsel %vm681_vm0, %v3312_v8, 0 }
 0xa9f   : > { %v1679_v12 = vmul.bf16 1069105081, %v1676_v11  ;;  %v552_v11 = vunpack.c.1.s8 %v538_v9  ;;  %v2063_v9 = vstv %s2791_s27  ;;  %s3553_s27 = smov [#allocation7]  }
 0xaa0   : > { %v1675_v41 = vpop.xlane.xlu1 %1674 }
 0xaa1   : > { %3383 = vpow.bf16 %v1679_v12  ;;  %v1677_v13 = vsub.bf16 %v1671_v4, %v1675_v41  ;;  %v569_v12 = vcvt.s32.f32 %v553_v10  ;;  %v570_v41 = vcvt.s32.f32 %v554_v43  ;;  %v2901_v10 = vld [vmem:[%s3760_s2 + $0x38] sm:$0xff]  }
 0xaa3   : > { %v1682_v14 = vmul.bf16 1069105081, %v1677_v13  ;;  %v567_v13 = vcvt.s32.f32 %v551_v27  ;;  %v2047_v27 = vstv %s2042_s17  ;;  %s3438_s17 = sshll.u32 %s3553_s27, 4  ;;  %s3439_s17 = int_to_ptr.vmem [resolvable:$false] %s3438_s17 }
 0xaa5   : > { %3385 = vpow.bf16 %v1682_v14  ;;  %v568_v14 = vcvt.s32.f32 %v552_v11 }
 0xaac   : > { %v3384_v15 = vpop.eup %3383 }
 0xaad   : > { %v1685_v16 = vunpack.c.h.bf16 %v3384_v15  ;;  %v1684_v17 = vunpack.c.l.bf16 %v3384_v15 }
 0xaaf   : > { %1690 = vadd.xlane.f32.xlu1 %v1685_v16  ;;  %1688 = vadd.xlane.f32.xlu0 %v1684_v17  ;;  %v586_v16 = vmul.f32 -1e+09, %v570_v41  ;;  %v583_v17 = vmul.f32 -1e+09, %v567_v13 }
 0xab0   : > { %v3386_v18 = vpop.eup %3385 }
 0xab1   : > { %v1687_v19 = vunpack.c.h.bf16 %v3386_v18  ;;  %v1686_v20 = vunpack.c.l.bf16 %v3386_v18 }
 0xab3   : > { %1694 = vadd.xlane.f32.xlu1 %v1687_v19  ;;  %1692 = vadd.xlane.f32.xlu0 %v1686_v20 }
 0xb3c   : > { %v1691_v29 = vpop.xlane.xlu1 %1690  ;;  %v1689_v31 = vpop.xlane.xlu0 %1688 }
 0xb3d   : > { %3387 = vrcp.f32 %v1691_v29 }
 0xb3e   : > { %3389 = vrcp.f32 %v1689_v31 }
 0xb40   : > { %v1695_v62 = vpop.xlane.xlu1 %1694  ;;  %v1693_v32 = vpop.xlane.xlu0 %1692 }
 0xb41   : > { %3391 = vrcp.f32 %v1695_v62 }
 0xb42   : > { %3393 = vrcp.f32 %v1693_v32 }
 0xb47   : > { %v3388_v33 = vpop.eup %3387 }
 0xb48   : > { %v3390_v34 = vpop.eup %3389 }
 0xb49   : > { %v1700_v35 = vpack.c.bf16 %v3388_v33, %v3390_v34 }
 0xb4b   : > { %v3392_v36 = vpop.eup %3391  ;;  %v1702_v37 = vmul.bf16 %v3384_v15, %v1700_v35  ;;  %v585_v15 = vmul.f32 -1e+09, %v569_v12 }
 0xb4c   : > { %v3394_v38 = vpop.eup %3393 }
 0xb4d   : > { %v2718_v40 = vcombine.low %v1702_v37, %v1702_v37  ;;  %v2719_v42 = vcombine.high %v1702_v37, %v1702_v37  ;;  %3098 = vmatprep.mubr.bf16.mxu1 %v1702_v37  ;;  %v1701_v44 = vpack.c.bf16 %v3392_v36, %v3394_v38  ;;  %v4008_v25 = vpack.c.bf16 %v586_v16, %v585_v15 }
 0xb4f   : > { %2722 = vst [vmem:[%s3813_s29 + $0x20] sm:$0xf] %v2718_v40  ;;  %2723 = vst [vmem:[%s3813_s29 + $0x24] sm:$0xf] %v2719_v42  ;;  %v1703_v50 = vmul.bf16 %v3386_v18, %v1701_v44  ;;  %v584_v18 = vmul.f32 -1e+09, %v568_v14 }
 0xb51   : > { %v2720_v52 = vcombine.low %v1703_v50, %v1703_v50  ;;  %v2721_v53 = vcombine.high %v1703_v50, %v1703_v50  ;;  %3099 = vmatmul.mubr.bf16.vlgmr.msra.gmra.mrb[8].mxu1 %v1703_v50  ;;  %v4010_v1 = vpack.c.bf16 %v584_v18, %v583_v17  ;;  %v2886_v18 = vunpack.c.l.bf16 %v2901_v10 }
 0xb52   : > { %3103 = vmatpush3.bf16.xpose.msra.mxu1 %v1916_v30  ;;  %3118 = vmatprep.mubr.msk.bf16.mxu1 %vm681_vm0, %v3313_v49 }
 0xb53   : > { %2724 = vst [vmem:[%s3813_s29 + $0x28] sm:$0xf] %v2720_v52  ;;  %2725 = vst [vmem:[%s3813_s29 + $0x2c] sm:$0xf] %v2721_v53  ;;  %3167 = vmatprep.subr.msk.bf16.mxu1 %vm681_vm0, %v3306_v51 }
 0xb5a   : > { %3105 = vmatpush3.bf16.xpose.msra.mxu1 %v1919_v39 }
 0xb5b   : > { %3168 = vmatprep.subr.msk.bf16.mxu1 %vm681_vm0, %v3307_v54  ;;  %v2898_v54 = vld [vmem:[%s3754_s28 + $0x30] sm:$0xff]  }
 0xb62   : > { %3107 = vmatpush3.bf16.xpose.msra.mxu1 %v1922_v55 }
 0xb63   : > { %3169 = vmatprep.subr.msk.bf16.mxu1 %vm681_vm0, %v3308_v56  ;;  %v2900_v56 = vld [vmem:[%s3760_s2 + $0x30] sm:$0xff]   ;;  %s3551_s2 = smov 32  }
 0xb6a   : > { %3109 = vmatpush3.bf16.xpose.msra.mxu1 %v1925_v57 }
 0xb6b   : > { %3170 = vmatprep.subr.msk.bf16.mxu1 %vm681_vm0, %v3309_v0  ;;  %v2874_v0 = vunpack.c.l.bf16 %v2898_v54 }
 0xb72   : > { %3111 = vmatpush3.bf16.xpose.msra.mxu1 %v1928_v58 }
 0xb73   : > { %3171 = vmatprep.subr.msk.bf16.mxu1 %vm681_vm0, %v3310_v59  ;;  %v2875_v59 = vunpack.c.h.bf16 %v2898_v54 }
 0xb7a   : > { %3113 = vmatpush3.bf16.xpose.msra.mxu1 %v1931_v60  ;;  %v2053_v60 = vstv %s2790_s21 }
 0xb7b   : > { %3172 = vmatprep.subr.msk.bf16.mxu1 %vm681_vm0, %v3311_v61  ;;  %v2899_v61 = vld [vmem:[%s3754_s28 + $0x38] sm:$0xff]   ;;  %v2054_v11 = vmul.f32 %v2874_v0, %v2053_v60  ;;  %v2055_v16 = vmul.f32 %v2875_v59, %v2053_v60  ;;  %v3315_v59 = vld [vmem:[%s3797_s19 + $0xc0] sm:$0xff]   ;;  %s3552_s28 = smov 64  }
 0xb7c   : > { %v2878_v12 = vunpack.c.l.bf16 %v2899_v61  ;;  %v2879_v41 = vunpack.c.h.bf16 %v2899_v61  ;;  %3122 = vmatprep.subr.bf16.mxu0 %v3315_v59  ;;  %v3317_v61 = vld [vmem:[%s3797_s19 + $0xd0] sm:$0xff]  }
 0xb7d   : > { %3123 = vmatpush3.bf16.msra.mxu0 %v3315_v59 }
 0xb82   : > { %3115 = vmatpush3.bf16.xpose.msra.mxu1 %v1934_v63  ;;  %v2882_v63 = vunpack.c.l.bf16 %v2900_v56 }
 0xb83   : > { %3173 = vmatprep.subr.msk.bf16.mxu1 %vm681_vm0, %v3312_v8 }
 0xb84   : > { %v2064_v17 = vmul.f32 %v2882_v63, %v2063_v9  ;;  %v3318_v63 = vld [vmem:[%s3797_s19 + $0xd8] sm:$0xff]  }
 0xb8a   : > { %3117 = vmatpush3.bf16.xpose.msra.mxu1 %v1937_v2 }
 0xb91   : > { %3119 = vmatmul.mubr.msk.bf16.vlgmr.msra.gmra.mrb[12].mxu1 %vm681_vm0, %v3314_v3  ;;  %v2883_v3 = vunpack.c.h.bf16 %v2900_v56 }
 0xc24   : > { %v3999_v6 = vpop.f32.mrb[8].mxu1 }
 0xc25   : > { %v4001_v4 = vpop.f32.mrb[9].mxu1 }
 0xc26   : > { %v4003_v5 = vpop.f32.mrb[10].mxu1 }
 0xc27   : > { %v4005_v7 = vpop.f32.mrb[11].mxu1 }
 0xc64   : > { %v3120_v19 = vpop.f32.mrb[12].mxu1 }
 0xc65   : > { %v1973_v20 = vpop.f32.mrb[13].mxu1 }
 0xc66   : > { %v3121_v26 = vpop.f32.mrb[14].mxu1 }
 0xc67   : > { %v1989_v28 = vpack.c.bf16 %v3121_v26, %v3120_v19  ;;  %v1976_v29 = vpop.f32.mrb[15].mxu1  ;;  %v2887_v19 = vunpack.c.h.bf16 %v2901_v10 }
 0xc68   : > { %v1988_v31 = vpack.c.bf16 %v1976_v29, %v1973_v20  ;;  %v2065_v29 = vmul.f32 %v2883_v3, %v2063_v9 }
 0xc69   : > { %v1991_v62 = vadd.bf16 %v1989_v28, %v4008_v25 }
 0xc6a   : > { %v1990_v32 = vadd.bf16 %v1988_v31, %v4010_v1  ;;  %v2056_v31 = vmul.f32 %v2878_v12, %v2053_v60 }
 0xc6b   : > { %1994 = vmax.xlane.bf16.xlu1 %v1991_v62 }
 0xc6c   : > { %1992 = vmax.xlane.bf16.xlu0 %v1990_v32 }
 0xcfc   : > { %v1995_v33 = vpop.xlane.xlu1 %1994 }
 0xcfd   : > { %v1997_v34 = vsub.bf16 %v1991_v62, %v1995_v33  ;;  %v1993_v35 = vpop.xlane.xlu0 %1992  ;;  %v2057_v62 = vmul.f32 %v2879_v41, %v2053_v60  ;;  %v3316_v60 = vld [vmem:[%s3797_s19 + $0xc8] sm:$0xff]  }
 0xcfe   : > { %v1996_v36 = vsub.bf16 %v1990_v32, %v1993_v35  ;;  %3124 = vmatprep.subr.bf16.mxu0 %v3316_v60 }
 0xcff   : > { %v2002_v37 = vmul.bf16 1069105081, %v1997_v34  ;;  %3125 = vmatpush3.bf16.msra.mxu0 %v3316_v60 }
 0xd00   : > { %v1999_v38 = vmul.bf16 1069105081, %v1996_v36  ;;  %v2073_v36 = vstv %s2072_s30  ;;  %3126 = vmatprep.subr.bf16.mxu0 %v3317_v61  ;;  %s3440_s30 = scalar_lea.vmem %s3439_s17, 2048 }
 0xd02   : > { %3395 = vpow.bf16 %v1999_v38  ;;  %v2067_v38 = vmul.f32 %v2887_v19, %v2063_v9 }
 0xd03   : > { %3397 = vpow.bf16 %v2002_v37  ;;  %v2066_v37 = vmul.f32 %v2886_v18, %v2063_v9  ;;  %3127 = vmatpush3.bf16.msra.mxu0 %v3317_v61 }
 0xd04   : > { %3128 = vmatprep.subr.bf16.mxu0 %v3318_v63 }
 0xd07   : > { %3129 = vmatpush3.bf16.msra.mxu0 %v3318_v63 }
 0xd0d   : > { %v3396_v40 = vpop.eup %3395 }
 0xd0e   : > { %v2005_v42 = vunpack.c.h.bf16 %v3396_v40  ;;  %v2004_v44 = vunpack.c.l.bf16 %v3396_v40  ;;  %v3398_v49 = vpop.eup %3397 }
 0xd0f   : > { %v2007_v50 = vunpack.c.h.bf16 %v3398_v49  ;;  %v2006_v30 = vunpack.c.l.bf16 %v3398_v49 }
 0xd10   : > { %2010 = vadd.xlane.f32.xlu1 %v2005_v42  ;;  %2008 = vadd.xlane.f32.xlu0 %v2004_v44 }
 0xd14   : > { %2014 = vadd.xlane.f32.xlu1 %v2007_v50  ;;  %2012 = vadd.xlane.f32.xlu0 %v2006_v30 }
 0xd9d   : > { %v2011_v51 = vpop.xlane.xlu1 %2010  ;;  %v2009_v52 = vpop.xlane.xlu0 %2008 }
 0xd9e   : > { %3399 = vrcp.f32 %v2011_v51 }
 0xd9f   : > { %3401 = vrcp.f32 %v2009_v52 }
 0xda1   : > { %v2015_v53 = vpop.xlane.xlu1 %2014  ;;  %v2013_v39 = vpop.xlane.xlu0 %2012 }
 0xda2   : > { %3403 = vrcp.f32 %v2015_v53 }
 0xda3   : > { %3405 = vrcp.f32 %v2013_v39 }
 0xda8   : > { %v3400_v55 = vpop.eup %3399 }
 0xda9   : > { %v3402_v57 = vpop.eup %3401 }
 0xdaa   : > { %v2020_v58 = vpack.c.bf16 %v3400_v55, %v3402_v57 }
 0xdac   : > { %v3404_v8 = vpop.eup %3403  ;;  %v2022_v2 = vmul.bf16 %v3396_v40, %v2020_v58 }
 0xdad   : > { %v3406_v43 = vpop.eup %3405 }
 0xdae   : > { %v2021_v13 = vpack.c.bf16 %v3404_v8, %v3406_v43  ;;  %v2043_v14 = vunpack.c.l.bf16 %v2022_v2  ;;  %v2044_v15 = vunpack.c.h.bf16 %v2022_v2 }
 0xdb0   : > { %v2023_v20 = vmul.bf16 %v3398_v49, %v2021_v13  ;;  %v2048_v26 = vmul.f32 %v2047_v27, %v2043_v14  ;;  %v2049_v28 = vmul.f32 %v2047_v27, %v2044_v15  ;;  %v3319_v13 = vld [vmem:[%s3797_s19 + $0xe0] sm:$0xff]   ;;  %v3320_v14 = vld [vmem:[%s3797_s19 + $0xe8] sm:$0xff]   ;;  %v3321_v15 = vld [vmem:[%s3797_s19 + $0xf0] sm:$0xff]  }
 0xdb1   : > { %3130 = vmatprep.subr.bf16.mxu0 %v3319_v13 }
 0xdb2   : > { %v2058_v32 = vadd.f32 %v2054_v11, %v2048_v26  ;;  %v2059_v33 = vadd.f32 %v2055_v16, %v2049_v28  ;;  %v2045_v34 = vunpack.c.l.bf16 %v2023_v20  ;;  %v2046_v35 = vunpack.c.h.bf16 %v2023_v20  ;;  %3131 = vmatpush3.bf16.msra.mxu0 %v3319_v13  ;;  %v3322_v16 = vld [vmem:[%s3797_s19 + $0xf8] sm:$0xff]   ;;  %s2335_s19 = sshll.u32 %s3813_s29, 4  ;;  %s4051_s19 = int_to_ptr.vmem [resolvable:$true] %s2335_s19 }
 0xdb3   : > { %3132 = vmatprep.subr.bf16.mxu0 %v3320_v14  ;;  %s3434_s21 = scalar_lea.vmem %s4051_s19, 1024  ;;  %p3441_p0 = scmp.lt.s32.totalorder %s4051_s19, %s3439_s17 }
 0xdb4   : > { %v2068_v40 = vadd.f32 %v2064_v17, %v2058_v32  ;;  %v2069_v42 = vadd.f32 %v2065_v29, %v2059_v33  ;;  %v2050_v44 = vmul.f32 %v2047_v27, %v2045_v34  ;;  %v2051_v50 = vmul.f32 %v2047_v27, %v2046_v35  ;;  %p3435_p10 = scmp.ne.s32.totalorder %s4051_s19, %s3434_s21  ;;  %p3442_p1 = scmp.lt.s32.totalorder %s3440_s30, %s3434_s21 }
 0xdb6   : > { %v2074_v30 = vadd.f32 %v2073_v36, %v2068_v40  ;;  %v2075_v49 = vadd.f32 %v2073_v36, %v2069_v42  ;;  %v2060_v51 = vadd.f32 %v2056_v31, %v2050_v44  ;;  %v2061_v52 = vadd.f32 %v2057_v62, %v2051_v50  ;;  %3133 = vmatpush3.bf16.msra.mxu0 %v3320_v14  ;;  %p3436_p11 = pnand %p3435_p10, %p3652_p4  ;;  %p3443_p2 = por %p3442_p1, %p3441_p0 }
 0xdb7   : > { %3134 = vmatprep.subr.bf16.mxu0 %v3321_v15 }
 0xdb8   : > { %v2078_v53 = vpack.c.bf16 %v2075_v49, %v2074_v30  ;;  %v2070_v39 = vadd.f32 %v2066_v37, %v2060_v51  ;;  %v2071_v54 = vadd.f32 %v2067_v38, %v2061_v52  ;;  %p3437_p13 = pneg %p3436_p11 }
 0xdba   : > { %v2080_v55 = vadd.bf16 %v2078_v53, %v4010_v1  ;;  %v2076_v56 = vadd.f32 %v2073_v36, %v2070_v39  ;;  %v2077_v57 = vadd.f32 %v2073_v36, %v2071_v54  ;;  %3135 = vmatpush3.bf16.msra.mxu0 %v3321_v15  ;;  %p3444_p3 = pnand %p3443_p2, %p3437_p13 }
 0xdbb   : > { %3136 = vmatprep.subr.bf16.mxu0 %v3322_v16 }
 0xdbc   : > { %2082 = vmax.xlane.bf16.xlu0 %v2080_v55  ;;  %v2079_v0 = vpack.c.bf16 %v2077_v57, %v2076_v56 }
 0xdbe   : > { %v2081_v58 = vadd.bf16 %v2079_v0, %v4008_v25  ;;  %3137 = vmatpush3.bf16.msra.mxu0 %v3322_v16 }
 0xdc0   : > { %2084 = vmax.xlane.bf16.xlu1 %v2081_v58 }
 0xe4d   : > { %v2083_v1 = vpop.xlane.xlu0 %2082 }
 0xe4e   : > { %v2086_v8 = vsub.bf16 %v2080_v55, %v2083_v1 }
 0xe50   : > { %v2089_v2 = vmul.bf16 1069105081, %v2086_v8 }
 0xe51   : > { %v2085_v3 = vpop.xlane.xlu1 %2084 }
 0xe52   : > { %3407 = vpow.bf16 %v2089_v2  ;;  %v2087_v25 = vsub.bf16 %v2081_v58, %v2085_v3 }
 0xe54   : > { %v2092_v9 = vmul.bf16 1069105081, %v2087_v25 }
 0xe56   : > { %3409 = vpow.bf16 %v2092_v9 }
 0xe5d   : > { %v3408_v10 = vpop.eup %3407 }
 0xe5e   : > { %v2095_v43 = vunpack.c.h.bf16 %v3408_v10  ;;  %v2094_v27 = vunpack.c.l.bf16 %v3408_v10 }
 0xe60   : > { %2100 = vadd.xlane.f32.xlu1 %v2095_v43  ;;  %2098 = vadd.xlane.f32.xlu0 %v2094_v27 }
 0xe61   : > { %v3410_v11 = vpop.eup %3409 }
 0xe62   : > { %v2097_v12 = vunpack.c.h.bf16 %v3410_v11  ;;  %v2096_v41 = vunpack.c.l.bf16 %v3410_v11 }
 0xe64   : > { %2104 = vadd.xlane.f32.xlu1 %v2097_v12  ;;  %2102 = vadd.xlane.f32.xlu0 %v2096_v41 }
 0xe75   : > { %2236 = vrot.lane.b32.xlu1 %v3928_v24, %s3551_s2 }
 0xe79   : > { %2238 = vrot.lane.b32.xlu1 %v3922_v21, %s3551_s2 }
 0xe7a   : > { %2234 = vrot.lane.b32.xlu0 %v3924_v22, %s3551_s2 }
 0xe7d   : > { %2240 = vrot.lane.b32.xlu1 %v3926_v23, %s3551_s2 }
 0xe7e   : > { %2250 = vrot.lane.b32.xlu0 %v4001_v4, %s3552_s28 }
 0xe81   : > { %2252 = vrot.lane.b32.xlu1 %v4005_v7, %s3552_s28 }
 0xe82   : > { %2254 = vrot.lane.b32.xlu0 %v3999_v6, %s3552_s28 }
 0xe85   : > { %2256 = vrot.lane.b32.xlu1 %v4003_v5, %s3552_s28 }
 0xeed   : > { %v2101_v21 = vpop.xlane.xlu1 %2100  ;;  %v2099_v22 = vpop.xlane.xlu0 %2098 }
 0xeee   : > { %3411 = vrcp.f32 %v2101_v21 }
 0xeef   : > { %3413 = vrcp.f32 %v2099_v22 }
 0xef1   : > { %v2105_v23 = vpop.xlane.xlu1 %2104  ;;  %v2103_v24 = vpop.xlane.xlu0 %2102 }
 0xef2   : > { %3415 = vrcp.f32 %v2105_v23 }
 0xef3   : > { %3417 = vrcp.f32 %v2103_v24 }
 0xef8   : > { %v3412_v4 = vpop.eup %3411 }
 0xef9   : > { %v3414_v17 = vpop.eup %3413 }
 0xefa   : > { %v2110_v7 = vpack.c.bf16 %v3412_v4, %v3414_v17 }
 0xefc   : > { %v3416_v6 = vpop.eup %3415  ;;  %v2112_v18 = vmul.bf16 %v3408_v10, %v2110_v7 }
 0xefd   : > { %v3418_v5 = vpop.eup %3417 }
 0xefe   : > { %v2792_v19 = vcombine.low %v2112_v18, %v2112_v18  ;;  %v2793_v20 = vcombine.high %v2112_v18, %v2112_v18  ;;  %3138 = vmatprep.mubr.bf16.mxu0 %v2112_v18  ;;  %v2111_v26 = vpack.c.bf16 %v3416_v6, %v3418_v5 }
 0xf00   : > { %2796 = vst [vmem:[%s3813_s29 + $0x30] sm:$0xf] %v2792_v19  ;;  %2797 = vst [vmem:[%s3813_s29 + $0x34] sm:$0xf] %v2793_v20  ;;  %v2113_v28 = vmul.bf16 %v3410_v11, %v2111_v26 }
 0xf02   : > { %v2794_v29 = vcombine.low %v2113_v28, %v2113_v28  ;;  %v2795_v31 = vcombine.high %v2113_v28, %v2113_v28  ;;  %3139 = vmatmul.mubr.bf16.vlgmr.msra.gmra.mrb[12].mxu0 %v2113_v28 }
 0xf04   : > { %2798 = vst [vmem:[%s3813_s29 + $0x38] sm:$0xf] %v2794_v29  ;;  %2799 = vst [vmem:[%s3813_s29 + $0x3c] sm:$0xf] %v2795_v31 }
 0xfd5   : > { %v3140_v62 = vpop.f32.mrb[12].mxu0 }
 0xfd6   : > { %3447 = shalt.err (!%p3444_p3)
}
 0xfd7   : > { %s3448_s29 = scalar_lea.hbm %s4048_s24, 1024  ;;  %s3452_s0 = scalar_lea.hbm %s4159_s9, 2048 }
 0xfd8   : > { %p3449_p5 = scmp.ne.s32.totalorder %s4048_s24, %s3448_s29  ;;  %p3453_p9 = scmp.lt.u32.totalorder %s4048_s24, %s4159_s9 }
 0xfd9   : > { %p3454_p12 = scmp.lt.u32.totalorder %s3452_s0, %s3448_s29  ;;  %p3456_p11 = scmp.lt.u32.totalorder %s3448_s29, %s4048_s24 }
 0xfda   : > { %p3450_p6 = pnand %p3449_p5, %p3652_p4 }
 0xfdb   : > { %p3455_p10 = por %p3454_p12, %p3453_p9 }
 0xfdc   : > { %p3451_p7 = pneg %p3450_p6 }
 0xfdd   : > { %p3457_p13 = por %p3456_p11, %p3455_p10 }
 0xfdf   : > { %p3458_p0 = pnand %p3457_p13, %p3451_p7 }
 0xfe1   : > { %3461 = shalt.err (!%p3458_p0)
}
 0xfe2   : > { %s3554_s21 = smov 4   ;;  %v2215_v32 = vpop.f32.mrb[13].mxu0  ;;  %s3555_s17 = smov 96   ;;  %v2237_v35 = vpop.permute.xlu1 %2236  ;;  %vm2282_vm1 = vcmask 523264   ;;  %vm2287_vm2 = vcmask 785408  }
 0xfe3   : > { %3179 = dma.vmem_to_hbm [thread:$0]  (%p3652_p4), %s4051_s19, 1024, %s4048_s24, %s2302_s26, %s3552_s28, %s3552_s28, %s3554_s21   ;;  %v3141_v33 = vpop.f32.mrb[14].mxu0  ;;  %v2235_v37 = vpop.permute.xlu0 %2234  ;;  %v2279_v52 = vsel %vm681_vm0, %v3851_v48, %v2237_v35 }
 0xfe4   : > { %2266 = vrot.lane.b32.xlu0 %v2215_v32, %s3555_s17  ;;  %v2218_v34 = vpop.f32.mrb[15].mxu0  ;;  %s2546_s30 = sshll.u32 %s3810_s10, 5  ;;  %v2278_v30 = vsel %vm681_vm0, %v3847_v46, %v2235_v37  ;;  %s2822_s19 = sshll.u32 %s3540_s14, 9 }
 0xfe5   : > { %2268 = vrot.lane.b32.xlu1 %v2218_v34, %s3555_s17  ;;  %s476_s28 = scalar_lea.vmem [#allocation6], %s2546_s30  ;;  %s4100_s29 = scalar_lea.hbm %s4158_s8, %s2822_s19 }
 0xfe6   : > { %v2239_v36 = vpop.permute.xlu1 %2238  ;;  %s2317_s24 = sshll.u32 %s476_s28, 4  ;;  %s2297_s2 = scalar_lea.sflag [#allocation4], %s3810_s10  ;;  %s4092_s24 = int_to_ptr.vmem [resolvable:$true] %s2317_s24 }
 0xfe7   : > { %v2251_v40 = vpop.permute.xlu0 %2250  ;;  %v2280_v55 = vsel %vm681_vm0, %v3845_v45, %v2239_v36  ;;  %s3462_s25 = scalar_lea.vmem %s4092_s24, 512  ;;  %s3556_s0 = smov [#allocation6]  }
 0xfe8   : > { %2270 = vrot.lane.b32.xlu0 %v3140_v62, %s3555_s17  ;;  %v2283_v49 = vsel %vm2282_vm1, %v2278_v30, %v2251_v40  ;;  %p3463_p1 = scmp.ne.s32.totalorder %s4092_s24, %s3462_s25  ;;  %s3466_s1 = sshll.u32 %s3556_s0, 4  ;;  %s3467_s1 = int_to_ptr.vmem [resolvable:$false] %s3466_s1 }
 0xfe9   : > { %2272 = vrot.lane.b32.xlu1 %v3141_v33, %s3555_s17  ;;  %s3468_s27 = scalar_lea.vmem %s3467_s1, 1024  ;;  %p3469_p5 = scmp.lt.s32.totalorder %s4092_s24, %s3467_s1 }
 0xfea   : > { %v2241_v38 = vpop.permute.xlu1 %2240  ;;  %p3464_p2 = pnand %p3463_p1, %p3652_p4  ;;  %p3470_p6 = scmp.lt.s32.totalorder %s3468_s27, %s3462_s25 }
 0xfeb   : > { %v2255_v44 = vpop.permute.xlu0 %2254  ;;  %v2281_v57 = vsel %vm681_vm0, %v3849_v47, %v2241_v38 }
 0xfec   : > { %v2285_v56 = vsel %vm2282_vm1, %v2280_v55, %v2255_v44  ;;  %p3465_p3 = pneg %p3464_p2  ;;  %p3471_p7 = por %p3470_p6, %p3469_p5 }
 0xfee   : > { %v2253_v42 = vpop.permute.xlu1 %2252  ;;  %p3472_p9 = pnand %p3471_p7, %p3465_p3 }
 0xfef   : > { %v2284_v39 = vsel %vm2282_vm1, %v2279_v52, %v2253_v42 }
 0xff2   : > { %v2257_v50 = vpop.permute.xlu1 %2256 }
 0xff3   : > { %v2286_v45 = vsel %vm2282_vm1, %v2281_v57, %v2257_v50 }
0x1056   : > { %v2267_v51 = vpop.permute.xlu0 %2266 }
0x1057   : > { %v2288_v53 = vsel %vm2287_vm2, %v2283_v49, %v2267_v51  ;;  %v2269_v54 = vpop.permute.xlu1 %2268 }
0x1058   : > { %2292 = vst [vmem:[%s476_s28] sm:$0xff] %v2288_v53  ;;  %v2289_v46 = vsel %vm2287_vm2, %v2284_v39, %v2269_v54 }
0x1059   : > { %2293 = vst [vmem:[%s476_s28 + $0x8] sm:$0xff] %v2289_v46 }
0x105a   : > { %v2271_v48 = vpop.permute.xlu0 %2270 }
0x105b   : > { %v2290_v0 = vsel %vm2287_vm2, %v2285_v56, %v2271_v48  ;;  %v2273_v58 = vpop.permute.xlu1 %2272 }
0x105c   : > { %2294 = vst [vmem:[%s476_s28 + $0x10] sm:$0xff] %v2290_v0  ;;  %v2291_v59 = vsel %vm2287_vm2, %v2286_v45, %v2273_v58 }
0x105d   : > { %2295 = vst [vmem:[%s476_s28 + $0x18] sm:$0xff] %v2291_v59 }
0x105e   : > { %3475 = shalt.err (!%p3472_p9)
}
0x105f   : > { %s3476_s21 = scalar_lea.hbm %s4100_s29, 512  ;;  %s3480_s28 = scalar_lea.hbm %s4158_s8, 1024 }
0x1060   : > { %p3477_p12 = scmp.ne.s32.totalorder %s4100_s29, %s3476_s21  ;;  %p3481_p13 = scmp.lt.u32.totalorder %s4100_s29, %s4158_s8 }
0x1061   : > { %p3482_p0 = scmp.lt.u32.totalorder %s3480_s28, %s3476_s21  ;;  %p3484_p2 = scmp.lt.u32.totalorder %s3476_s21, %s4100_s29 }
0x1062   : > { %p3478_p10 = pnand %p3477_p12, %p3652_p4 }
0x1063   : > { %p3483_p1 = por %p3482_p0, %p3481_p13 }
0x1064   : > { %p3479_p11 = pneg %p3478_p10 }
0x1065   : > { %p3485_p3 = por %p3484_p2, %p3483_p1 }
0x1067   : > { %p3486_p5 = pnand %p3485_p3, %p3479_p11 }
0x1069   : > { %3489 = shalt.err (!%p3486_p5)
}
0x106a   : > { %s3557_s26 = smov 128   ;;  %s3558_s25 = smov 8  }
0x106b   : > { %3178 = dma.vmem_to_hbm [thread:$0]  (%p3652_p4), %s4092_s24, 512, %s4100_s29, %s2297_s2, %s3557_s26, %s3557_s26, %s3558_s25  }
0x106c PF: > { %p3195_p6 = scmp.ge.s32.totalorder %s3548_s16, 2  ;;  %s2350_s0 = sand.u32 1, %s3528_s11  }
0x106d   : > { %s2351_s1 = scalar_lea.sflag [#allocation4], %s2350_s0 }
0x106e   : > { %p3187_p7 = pnand %p3195_p6, %p3659_p8 }
0x1070   : > { %3519 = dma.done.wait (!%p3187_p7), %s2351_s1, 512  }
0x1071   : > { %3521 = vsyncadd (!%p3187_p7), %s2351_s1, 4294966784  ;;  %s2360_s27 = scalar_lea.sflag [#allocation8], %s2350_s0 }
0x1072   : > { %3523 = dma.done.wait (!%p3187_p7), %s2360_s27, 1024  }
0x1073   : > { %3525 = vsyncadd (!%p3187_p7), %s2360_s27, 4294966272  ;;  %s28_s16 = sadd.s32 1, %s3548_s16   ;;  %s4170_s11 = smov %s3532_s12 }
0x1074   : > { %p25_p9 = scmp.ge.s32.totalorder %s28_s16, 4   ;;  %s4171_s12 = smov %s3536_s13 }
0x1075   : > { %s4172_s13 = smov %s3665_s23  ;;  %s4173_s14 = smov %s3544_s15 }
0x1076   : > { %s4174_s15 = smov %s4176_s18  ;;  %27 = sbr.rel (!%p25_p9) target bundleno = 11 (0xb), region = 142 }
0x107d   :  { %2365 = vsyncpa [#allocation4], 1 }
0x107e   :  { %2367 = vsyncpa [#allocation4 + $0x1], 1 }
0x107f   :  { %2368 = vsyncpa [#allocation8], 1 }
0x1080   :  { %2370 = vsyncpa [#allocation8 + $0x1], 1 }
0x1081   :  { %2371 = vsyncpa [#allocation5], 1 }
0x1082   :  { %2373 = vsyncpa [#allocation5 + $0x1], 1 }

</bundles_post_ra>
